<compile_context>
chip_gen: v5e
topology: v5e:2x2
jax: 0.10.0
libtpu: 0.0.40
codegen_flags: <defaults>
</compile_context>

<pallas_src>
import functools
import math

import jax
import jax.numpy as jnp
from jax import lax
from jax.experimental import pallas as pl
from jax.experimental.pallas import tpu as pltpu

_LANE = 128


def _round_up(x, m):
    return (x + m - 1) // m * m


# ------------------------------ fused kernel --------------------------------

def _gbottleneck_kernel(x_ref, adj_ref, w1_ref, b1_ref, wblk_ref, bblk_ref,
                        w2_ref, b2_ref, out_ref, hidden_ref, *,
                        block_num, activation):
    """One grid step == one batch element."""
    adj = adj_ref[...]                                  # (N, N) bf16, resident

    def gconv(h, wcat, bias, relu):
        # h: (N, Fin) activations; wcat = [W | W_loop] padded to (Fin, 2*Fp),
        # Fp a multiple of 128 so the split below is lane-aligned.
        fp = wcat.shape[-1] // 2
        supcat = jnp.dot(h.astype(jnp.bfloat16), wcat,
                         preferred_element_type=jnp.float32)      # (N, 2*Fp)
        sup = supcat[:, :fp]                                       # adj branch
        sup_loop = supcat[:, fp:]                                  # loop branch
        agg = jnp.dot(adj, sup.astype(jnp.bfloat16),
                      preferred_element_type=jnp.float32)          # (N, Fp)
        out = agg + sup_loop + bias                                # f32 epilogue
        if relu:
            out = jnp.maximum(out, 0.0)
        return out

    x = x_ref[0]                                        # (N, in_dim) bf16
    # conv1 (+ optional relu)
    h = gconv(x, w1_ref[...], b1_ref[...], activation)

    # GResBlocks: fori_loop bounds live ranges; block weights indexed dynamically.
    def block_body(i, h):
        t = gconv(h, wblk_ref[2 * i], bblk_ref[2 * i], activation)
        t = gconv(t, wblk_ref[2 * i + 1], bblk_ref[2 * i + 1], activation)
        return (h + t) * 0.5

    h = lax.fori_loop(0, block_num, block_body, h)

    hidden_ref[0] = h.astype(hidden_ref.dtype)          # lane-dense padded store
    # final conv (no activation, matching the PyTorch forward)
    out_ref[0] = gconv(h, w2_ref[...], b2_ref[...], False).astype(out_ref.dtype)


# --------------------------- parameter setup --------------------------------

def init_gconv_params(key, fin, fout):
    k1, k2, k3 = jax.random.split(key, 3)
    scale = 1.0 / jnp.sqrt(jnp.float32(fin))
    w = jax.random.normal(k1, (fin, fout), jnp.float32) * scale
    wl = jax.random.normal(k2, (fin, fout), jnp.float32) * scale
    b = jax.random.normal(k3, (1, fout), jnp.float32) * 0.01
    return (w, wl, b)


def init_gbottleneck_params(key, block_num, in_dim, hidden_dim, out_dim):
    keys = jax.random.split(key, 2 + 2 * block_num)
    conv1 = init_gconv_params(keys[0], in_dim, hidden_dim)
    conv2 = init_gconv_params(keys[1], hidden_dim, out_dim)
    blocks = []
    for i in range(block_num):
        p1 = init_gconv_params(keys[2 + 2 * i], hidden_dim, hidden_dim)
        p2 = init_gconv_params(keys[3 + 2 * i], hidden_dim, hidden_dim)
        blocks.append((p1, p2))
    return {"conv1": conv1, "conv2": conv2, "blocks": blocks}


def _prepare_fused_params(params):
    """[W | W_loop] fused weights, each half padded to a 128-lane multiple."""
    hidden = params["conv1"][0].shape[1]
    out_dim = params["conv2"][0].shape[1]
    in_dim = params["conv1"][0].shape[0]
    fp_h = _round_up(hidden, _LANE)
    fp_o = _round_up(out_dim, _LANE)

    def cat(p, fin_pad, fout_pad):
        w, wl, b = p
        fin, fout = w.shape

        def pad(m):
            return jnp.pad(m, ((0, fin_pad - fin), (0, fout_pad - fout)))

        wcat = jnp.concatenate([pad(w), pad(wl)], axis=-1).astype(jnp.bfloat16)
        bp = jnp.pad(b, ((0, 0), (0, fout_pad - fout))).astype(jnp.float32)
        return wcat, bp

    w1, b1 = cat(params["conv1"], in_dim, fp_h)   # feature-matmul K left unpadded
    w2, b2 = cat(params["conv2"], fp_h, fp_o)
    wblk_list, bblk_list = [], []
    for (p1, p2) in params["blocks"]:
        for p in (p1, p2):
            w, b = cat(p, fp_h, fp_h)
            wblk_list.append(w)
            bblk_list.append(b)
    if wblk_list:
        wblk = jnp.stack(wblk_list, axis=0)
        bblk = jnp.stack(bblk_list, axis=0)
    else:  # dummy (unused) buffers when block_num == 0
        wblk = jnp.zeros((1, fp_h, 2 * fp_h), jnp.bfloat16)
        bblk = jnp.zeros((1, 1, fp_h), jnp.float32)
    return w1, b1, wblk, bblk, w2, b2, fp_h, fp_o


# ------------------------------ forward pass ---------------------------------

def gbottleneck_forward(x, adj, params, activation=True):
    B, N, in_dim = x.shape
    hidden = params["conv1"][0].shape[1]
    out_dim = params["conv2"][0].shape[1]
    block_num = len(params["blocks"])

    w1, b1, wblk, bblk, w2, b2, fp_h, fp_o = _prepare_fused_params(params)
    adj_bf = adj.astype(jnp.bfloat16)
    x_bf = x.astype(jnp.bfloat16)

    kernel = functools.partial(_gbottleneck_kernel,
                               block_num=block_num, activation=activation)

    inputs = (x_bf, adj_bf, w1, b1, wblk, bblk, w2, b2)
    out_shapes = (jax.ShapeDtypeStruct((B, N, fp_o), jnp.float32),
                  jax.ShapeDtypeStruct((B, N, fp_h), jnp.float32))

    # ---- VMEM budget (residents + per-step blocks, doubled, plus headroom) ----
    in_bytes = sum(int(a.size) * a.dtype.itemsize for a in inputs)
    out_bytes = sum(math.prod(s.shape) * jnp.dtype(s.dtype).itemsize
                    for s in out_shapes)
    vmem_limit = int(min(max(2 * (in_bytes + out_bytes) + (8 << 20), 16 << 20),
                         64 << 20))

    # ---- cost estimate (advisory for XLA scheduling) ----
    def gconv_flops(fin, fp):
        return 2 * N * fin * (2 * fp) + 2 * N * N * fp

    flops = B * (gconv_flops(in_dim, fp_h)
                 + 2 * block_num * gconv_flops(fp_h, fp_h)
                 + gconv_flops(fp_h, fp_o))
    cost = pl.CostEstimate(flops=flops, transcendentals=0,
                           bytes_accessed=in_bytes + out_bytes)

    grid_spec = pltpu.PrefetchScalarGridSpec(
        num_scalar_prefetch=0,
        grid=(B,),
        in_specs=[
            pl.BlockSpec((1, N, in_dim), lambda b: (b, 0, 0)),   # x: per-batch
            pl.BlockSpec((N, N), lambda b: (0, 0)),              # adj: resident
            pl.BlockSpec(w1.shape, lambda b: (0, 0)),
            pl.BlockSpec(b1.shape, lambda b: (0, 0)),
            pl.BlockSpec(wblk.shape, lambda b: (0, 0, 0)),
            pl.BlockSpec(bblk.shape, lambda b: (0, 0, 0)),
            pl.BlockSpec(w2.shape, lambda b: (0, 0)),
            pl.BlockSpec(b2.shape, lambda b: (0, 0)),
        ],
        out_specs=(
            pl.BlockSpec((1, N, fp_o), lambda b: (b, 0, 0)),
            pl.BlockSpec((1, N, fp_h), lambda b: (b, 0, 0)),
        ),
    )

    out_p, hidden_p = pl.pallas_call(
        kernel,
        grid_spec=grid_spec,
        out_shape=out_shapes,
        compiler_params=pltpu.CompilerParams(
            dimension_semantics=("parallel",),
            vmem_limit_bytes=vmem_limit),
        cost_estimate=cost,
    )(*inputs)

    # Drop lane padding outside the kernel (cheap XLA slice).
    return out_p[..., :out_dim], hidden_p[..., :hidden]


# -------------------------- pure-JAX f32 reference ---------------------------

def _gconv_ref(x, adj, w, wl, b, relu):
    sup = jnp.einsum('bnf,fg->bng', x, w)
    out = (jnp.einsum('nm,bmg->bng', adj, sup)
           + jnp.einsum('bnf,fg->bng', x, wl) + b)
    return jnp.maximum(out, 0.0) if relu else out


def gbottleneck_reference(x, adj, params, activation=True):
    h = _gconv_ref(x, adj, *params["conv1"], activation)
    for (p1, p2) in params["blocks"]:
        t = _gconv_ref(h, adj, *p1, activation)
        t = _gconv_ref(t, adj, *p2, activation)
        h = (h + t) * 0.5
    return _gconv_ref(h, adj, *params["conv2"], False), h


# --------------------------------- main --------------------------------------

if __name__ == "__main__":
    B, N = 2, 128            # batch, num graph nodes
    in_dim, hidden_dim, out_dim = 16, 32, 8
    block_num = 2

    key = jax.random.PRNGKey(0)
    k_x, k_p = jax.random.split(key)

    # deterministic ring-graph adjacency, row-normalized, dense
    idx = jnp.arange(N)
    adj = jnp.zeros((N, N), jnp.float32)
    adj = adj.at[idx, (idx + 1) % N].set(1.0)
    adj = adj.at[idx, (idx - 1) % N].set(1.0)
    adj = adj / adj.sum(axis=1, keepdims=True)

    x = jax.random.normal(k_x, (B, N, in_dim), jnp.float32)
    params = init_gbottleneck_params(k_p, block_num, in_dim, hidden_dim, out_dim)

    x_out, x_hidden = gbottleneck_forward(x, adj, params, activation=True)
    jax.block_until_ready((x_out, x_hidden))

    assert x_out.shape == (B, N, out_dim)
    assert x_hidden.shape == (B, N, hidden_dim)

    # Validate bf16-operand / f32-accumulation kernel against an f32 reference.
    ref_out, ref_hidden = gbottleneck_reference(x, adj, params, activation=True)
    assert bool(jnp.allclose(x_out, ref_out, rtol=0.15, atol=0.15))
    assert bool(jnp.allclose(x_hidden, ref_hidden, rtol=0.15, atol=0.15))

    print("KERNEL_OK")
</pallas_src>

<mosaic_0001>
module attributes {stable_mosaic.version = 11 : i64} {
  func.func @_gbottleneck_kernel(%arg0: i32, %arg1: memref<1x128x16xbf16, #tpu.memory_space<vmem>>, %arg2: memref<128x128xbf16, #tpu.memory_space<vmem>>, %arg3: memref<16x256xbf16, #tpu.memory_space<vmem>>, %arg4: memref<1x128xf32, #tpu.memory_space<vmem>>, %arg5: memref<4x128x256xbf16, #tpu.memory_space<vmem>>, %arg6: memref<4x1x128xf32, #tpu.memory_space<vmem>>, %arg7: memref<128x256xbf16, #tpu.memory_space<vmem>>, %arg8: memref<1x128xf32, #tpu.memory_space<vmem>>, %arg9: memref<1x128x128xf32, #tpu.memory_space<vmem>>, %arg10: memref<1x128x128xf32, #tpu.memory_space<vmem>>) attributes {dimension_semantics = [#tpu.dimension_semantics<parallel>], iteration_bounds = array<i64: 2>, scalar_prefetch = 0 : i64, scratch_operands = 0 : i64, tpu.core_type = #tpu.core_type<tc>, window_params = [{transform_indices = @transform_0, window_bounds = array<i64: 1, 128, 16>}, {pipeline_mode = #tpu.pipeline_mode<synchronous>, transform_indices = @transform_1, window_bounds = array<i64: 128, 128>}, {pipeline_mode = #tpu.pipeline_mode<synchronous>, transform_indices = @transform_2, window_bounds = array<i64: 16, 256>}, {pipeline_mode = #tpu.pipeline_mode<synchronous>, transform_indices = @transform_3, window_bounds = array<i64: 1, 128>}, {pipeline_mode = #tpu.pipeline_mode<synchronous>, transform_indices = @transform_4, window_bounds = array<i64: 4, 128, 256>}, {pipeline_mode = #tpu.pipeline_mode<synchronous>, transform_indices = @transform_5, window_bounds = array<i64: 4, 1, 128>}, {pipeline_mode = #tpu.pipeline_mode<synchronous>, transform_indices = @transform_6, window_bounds = array<i64: 128, 256>}, {pipeline_mode = #tpu.pipeline_mode<synchronous>, transform_indices = @transform_7, window_bounds = array<i64: 1, 128>}, {transform_indices = @transform_8, window_bounds = array<i64: 1, 128, 128>}, {transform_indices = @transform_9, window_bounds = array<i64: 1, 128, 128>}]} {
    %c0 = arith.constant 0 : index
    %c0_0 = arith.constant 0 : index
    %0 = vector.load %arg2[%c0, %c0_0] : memref<128x128xbf16, #tpu.memory_space<vmem>>, vector<128x128xbf16>
    %c0_1 = arith.constant 0 : index
    %c0_2 = arith.constant 0 : index
    %c0_3 = arith.constant 0 : index
    %1 = vector.load %arg1[%c0_1, %c0_2, %c0_3] : memref<1x128x16xbf16, #tpu.memory_space<vmem>>, vector<1x128x16xbf16>
    %2 = vector.shape_cast %1 : vector<1x128x16xbf16> to vector<128x16xbf16>
    %c0_4 = arith.constant 0 : index
    %c0_5 = arith.constant 0 : index
    %3 = vector.load %arg3[%c0_4, %c0_5] : memref<16x256xbf16, #tpu.memory_space<vmem>>, vector<16x256xbf16>
    %c0_6 = arith.constant 0 : index
    %c0_7 = arith.constant 0 : index
    %4 = vector.load %arg4[%c0_6, %c0_7] : memref<1x128xf32, #tpu.memory_space<vmem>>, vector<1x128xf32>
    %cst = arith.constant dense<0.000000e+00> : vector<128x256xf32>
    %5 = tpu.matmul %2, %3, %cst {dimension_numbers = #tpu.dot_dimension_numbers<[1], [0], [0], [1], [0, 0, 1, 1], [], []>} : vector<128x16xbf16>, vector<16x256xbf16>, vector<128x256xf32> -> vector<128x256xf32>
    %6 = vector.extract_strided_slice %5 {offsets = [0, 0], sizes = [128, 128], strides = [1, 1]} : vector<128x256xf32> to vector<128x128xf32>
    %7 = vector.extract_strided_slice %5 {offsets = [0, 128], sizes = [128, 128], strides = [1, 1]} : vector<128x256xf32> to vector<128x128xf32>
    %8 = arith.truncf %6 : vector<128x128xf32> to vector<128x128xbf16>
    %cst_8 = arith.constant dense<0.000000e+00> : vector<128x128xf32>
    %9 = tpu.matmul %0, %8, %cst_8 {dimension_numbers = #tpu.dot_dimension_numbers<[1], [0], [0], [1], [0, 0, 1, 1], [], []>} : vector<128x128xbf16>, vector<128x128xbf16>, vector<128x128xf32> -> vector<128x128xf32>
    %10 = arith.addf %9, %7 : vector<128x128xf32>
    %11 = vector.broadcast %4 : vector<1x128xf32> to vector<128x128xf32>
    %12 = arith.addf %10, %11 : vector<128x128xf32>
    %cst_9 = arith.constant 0.000000e+00 : f32
    %13 = vector.broadcast %cst_9 : f32 to vector<128x128xf32>
    %14 = arith.maximumf %12, %13 : vector<128x128xf32>
    %c0_i32 = arith.constant 0 : i32
    %c2_i32 = arith.constant 2 : i32
    %15 = arith.addi %c0_i32, %c2_i32 : i32
    %c1_i32 = arith.constant 1 : i32
    %16 = scf.for %arg11 = %c0_i32 to %15 step %c1_i32 iter_args(%arg12 = %14) -> (vector<128x128xf32>)  : i32 {
      %c2_i32_23 = arith.constant 2 : i32
      %34 = arith.muli %c2_i32_23, %arg11 : i32
      %35 = arith.index_cast %34 : i32 to index
      %c0_24 = arith.constant 0 : index
      %c0_25 = arith.constant 0 : index
      %36 = vector.load %arg5[%35, %c0_24, %c0_25] : memref<4x128x256xbf16, #tpu.memory_space<vmem>>, vector<1x128x256xbf16>
      %37 = vector.shape_cast %36 : vector<1x128x256xbf16> to vector<128x256xbf16>
      %c2_i32_26 = arith.constant 2 : i32
      %38 = arith.muli %c2_i32_26, %arg11 : i32
      %39 = arith.index_cast %38 : i32 to index
      %c0_27 = arith.constant 0 : index
      %c0_28 = arith.constant 0 : index
      %40 = vector.load %arg6[%39, %c0_27, %c0_28] : memref<4x1x128xf32, #tpu.memory_space<vmem>>, vector<1x1x128xf32>
      %41 = vector.shape_cast %40 : vector<1x1x128xf32> to vector<1x128xf32>
      %42 = arith.truncf %arg12 : vector<128x128xf32> to vector<128x128xbf16>
      %cst_29 = arith.constant dense<0.000000e+00> : vector<128x256xf32>
      %43 = tpu.matmul %42, %37, %cst_29 {dimension_numbers = #tpu.dot_dimension_numbers<[1], [0], [0], [1], [0, 0, 1, 1], [], []>} : vector<128x128xbf16>, vector<128x256xbf16>, vector<128x256xf32> -> vector<128x256xf32>
      %44 = vector.extract_strided_slice %43 {offsets = [0, 0], sizes = [128, 128], strides = [1, 1]} : vector<128x256xf32> to vector<128x128xf32>
      %45 = vector.extract_strided_slice %43 {offsets = [0, 128], sizes = [128, 128], strides = [1, 1]} : vector<128x256xf32> to vector<128x128xf32>
      %46 = arith.truncf %44 : vector<128x128xf32> to vector<128x128xbf16>
      %cst_30 = arith.constant dense<0.000000e+00> : vector<128x128xf32>
      %47 = tpu.matmul %0, %46, %cst_30 {dimension_numbers = #tpu.dot_dimension_numbers<[1], [0], [0], [1], [0, 0, 1, 1], [], []>} : vector<128x128xbf16>, vector<128x128xbf16>, vector<128x128xf32> -> vector<128x128xf32>
      %48 = arith.addf %47, %45 : vector<128x128xf32>
      %49 = vector.broadcast %41 : vector<1x128xf32> to vector<128x128xf32>
      %50 = arith.addf %48, %49 : vector<128x128xf32>
      %cst_31 = arith.constant 0.000000e+00 : f32
      %51 = vector.broadcast %cst_31 : f32 to vector<128x128xf32>
      %52 = arith.maximumf %50, %51 : vector<128x128xf32>
      %c2_i32_32 = arith.constant 2 : i32
      %53 = arith.muli %c2_i32_32, %arg11 : i32
      %c1_i32_33 = arith.constant 1 : i32
      %54 = arith.addi %53, %c1_i32_33 : i32
      %55 = arith.index_cast %54 : i32 to index
      %c0_34 = arith.constant 0 : index
      %c0_35 = arith.constant 0 : index
      %56 = vector.load %arg5[%55, %c0_34, %c0_35] : memref<4x128x256xbf16, #tpu.memory_space<vmem>>, vector<1x128x256xbf16>
      %57 = vector.shape_cast %56 : vector<1x128x256xbf16> to vector<128x256xbf16>
      %c2_i32_36 = arith.constant 2 : i32
      %58 = arith.muli %c2_i32_36, %arg11 : i32
      %c1_i32_37 = arith.constant 1 : i32
      %59 = arith.addi %58, %c1_i32_37 : i32
      %60 = arith.index_cast %59 : i32 to index
      %c0_38 = arith.constant 0 : index
      %c0_39 = arith.constant 0 : index
      %61 = vector.load %arg6[%60, %c0_38, %c0_39] : memref<4x1x128xf32, #tpu.memory_space<vmem>>, vector<1x1x128xf32>
      %62 = vector.shape_cast %61 : vector<1x1x128xf32> to vector<1x128xf32>
      %63 = arith.truncf %52 : vector<128x128xf32> to vector<128x128xbf16>
      %cst_40 = arith.constant dense<0.000000e+00> : vector<128x256xf32>
      %64 = tpu.matmul %63, %57, %cst_40 {dimension_numbers = #tpu.dot_dimension_numbers<[1], [0], [0], [1], [0, 0, 1, 1], [], []>} : vector<128x128xbf16>, vector<128x256xbf16>, vector<128x256xf32> -> vector<128x256xf32>
      %65 = vector.extract_strided_slice %64 {offsets = [0, 0], sizes = [128, 128], strides = [1, 1]} : vector<128x256xf32> to vector<128x128xf32>
      %66 = vector.extract_strided_slice %64 {offsets = [0, 128], sizes = [128, 128], strides = [1, 1]} : vector<128x256xf32> to vector<128x128xf32>
      %67 = arith.truncf %65 : vector<128x128xf32> to vector<128x128xbf16>
      %cst_41 = arith.constant dense<0.000000e+00> : vector<128x128xf32>
      %68 = tpu.matmul %0, %67, %cst_41 {dimension_numbers = #tpu.dot_dimension_numbers<[1], [0], [0], [1], [0, 0, 1, 1], [], []>} : vector<128x128xbf16>, vector<128x128xbf16>, vector<128x128xf32> -> vector<128x128xf32>
      %69 = arith.addf %68, %66 : vector<128x128xf32>
      %70 = vector.broadcast %62 : vector<1x128xf32> to vector<128x128xf32>
      %71 = arith.addf %69, %70 : vector<128x128xf32>
      %cst_42 = arith.constant 0.000000e+00 : f32
      %72 = vector.broadcast %cst_42 : f32 to vector<128x128xf32>
      %73 = arith.maximumf %71, %72 : vector<128x128xf32>
      %74 = arith.addf %arg12, %73 : vector<128x128xf32>
      %cst_43 = arith.constant 5.000000e-01 : f32
      %75 = vector.broadcast %cst_43 : f32 to vector<128x128xf32>
      %76 = arith.mulf %74, %75 : vector<128x128xf32>
      scf.yield %76 : vector<128x128xf32>
    }
    %c2_i32_10 = arith.constant 2 : i32
    %c0_11 = arith.constant 0 : index
    %c0_12 = arith.constant 0 : index
    %c0_13 = arith.constant 0 : index
    %17 = vector.load %arg10[%c0_11, %c0_12, %c0_13] : memref<1x128x128xf32, #tpu.memory_space<vmem>>, vector<1x128x128xf32>
    %18 = vector.shape_cast %17 : vector<1x128x128xf32> to vector<128x128xf32>
    %19 = vector.shape_cast %16 : vector<128x128xf32> to vector<1x128x128xf32>
    tpu.vector_store %arg10[%c0_11, %c0_12, %c0_13], %19 {strides = array<i32>} : memref<1x128x128xf32, #tpu.memory_space<vmem>>, vector<1x128x128xf32>,
    %c0_14 = arith.constant 0 : index
    %c0_15 = arith.constant 0 : index
    %20 = vector.load %arg7[%c0_14, %c0_15] : memref<128x256xbf16, #tpu.memory_space<vmem>>, vector<128x256xbf16>
    %c0_16 = arith.constant 0 : index
    %c0_17 = arith.constant 0 : index
    %21 = vector.load %arg8[%c0_16, %c0_17] : memref<1x128xf32, #tpu.memory_space<vmem>>, vector<1x128xf32>
    %22 = arith.truncf %16 : vector<128x128xf32> to vector<128x128xbf16>
    %cst_18 = arith.constant dense<0.000000e+00> : vector<128x256xf32>
    %23 = tpu.matmul %22, %20, %cst_18 {dimension_numbers = #tpu.dot_dimension_numbers<[1], [0], [0], [1], [0, 0, 1, 1], [], []>} : vector<128x128xbf16>, vector<128x256xbf16>, vector<128x256xf32> -> vector<128x256xf32>
    %24 = vector.extract_strided_slice %23 {offsets = [0, 0], sizes = [128, 128], strides = [1, 1]} : vector<128x256xf32> to vector<128x128xf32>
    %25 = vector.extract_strided_slice %23 {offsets = [0, 128], sizes = [128, 128], strides = [1, 1]} : vector<128x256xf32> to vector<128x128xf32>
    %26 = arith.truncf %24 : vector<128x128xf32> to vector<128x128xbf16>
    %cst_19 = arith.constant dense<0.000000e+00> : vector<128x128xf32>
    %27 = tpu.matmul %0, %26, %cst_19 {dimension_numbers = #tpu.dot_dimension_numbers<[1], [0], [0], [1], [0, 0, 1, 1], [], []>} : vector<128x128xbf16>, vector<128x128xbf16>, vector<128x128xf32> -> vector<128x128xf32>
    %28 = arith.addf %27, %25 : vector<128x128xf32>
    %29 = vector.broadcast %21 : vector<1x128xf32> to vector<128x128xf32>
    %30 = arith.addf %28, %29 : vector<128x128xf32>
    %c0_20 = arith.constant 0 : index
    %c0_21 = arith.constant 0 : index
    %c0_22 = arith.constant 0 : index
    %31 = vector.load %arg9[%c0_20, %c0_21, %c0_22] : memref<1x128x128xf32, #tpu.memory_space<vmem>>, vector<1x128x128xf32>
    %32 = vector.shape_cast %31 : vector<1x128x128xf32> to vector<128x128xf32>
    %33 = vector.shape_cast %30 : vector<128x128xf32> to vector<1x128x128xf32>
    tpu.vector_store %arg9[%c0_20, %c0_21, %c0_22], %33 {strides = array<i32>} : memref<1x128x128xf32, #tpu.memory_space<vmem>>, vector<1x128x128xf32>,
    return
  }
  func.func @transform_0(%arg0: i32) -> (i32, i32, i32) {
    %c0_i32 = arith.constant 0 : i32
    %c0_i32_0 = arith.constant 0 : i32
    %c0_i32_1 = arith.constant 0 : i32
    return %arg0, %c0_i32, %c0_i32_0 : i32, i32, i32
  }
  func.func @transform_1(%arg0: i32) -> (i32, i32) {
    %c0_i32 = arith.constant 0 : i32
    %c0_i32_0 = arith.constant 0 : i32
    %c0_i32_1 = arith.constant 0 : i32
    return %c0_i32, %c0_i32_0 : i32, i32
  }
  func.func @transform_2(%arg0: i32) -> (i32, i32) {
    %c0_i32 = arith.constant 0 : i32
    %c0_i32_0 = arith.constant 0 : i32
    %c0_i32_1 = arith.constant 0 : i32
    return %c0_i32, %c0_i32_0 : i32, i32
  }
  func.func @transform_3(%arg0: i32) -> (i32, i32) {
    %c0_i32 = arith.constant 0 : i32
    %c0_i32_0 = arith.constant 0 : i32
    %c0_i32_1 = arith.constant 0 : i32
    return %c0_i32, %c0_i32_0 : i32, i32
  }
  func.func @transform_4(%arg0: i32) -> (i32, i32, i32) {
    %c0_i32 = arith.constant 0 : i32
    %c0_i32_0 = arith.constant 0 : i32
    %c0_i32_1 = arith.constant 0 : i32
    %c0_i32_2 = arith.constant 0 : i32
    return %c0_i32, %c0_i32_0, %c0_i32_1 : i32, i32, i32
  }
  func.func @transform_5(%arg0: i32) -> (i32, i32, i32) {
    %c0_i32 = arith.constant 0 : i32
    %c0_i32_0 = arith.constant 0 : i32
    %c0_i32_1 = arith.constant 0 : i32
    %c0_i32_2 = arith.constant 0 : i32
    return %c0_i32, %c0_i32_0, %c0_i32_1 : i32, i32, i32
  }
  func.func @transform_6(%arg0: i32) -> (i32, i32) {
    %c0_i32 = arith.constant 0 : i32
    %c0_i32_0 = arith.constant 0 : i32
    %c0_i32_1 = arith.constant 0 : i32
    return %c0_i32, %c0_i32_0 : i32, i32
  }
  func.func @transform_7(%arg0: i32) -> (i32, i32) {
    %c0_i32 = arith.constant 0 : i32
    %c0_i32_0 = arith.constant 0 : i32
    %c0_i32_1 = arith.constant 0 : i32
    return %c0_i32, %c0_i32_0 : i32, i32
  }
  func.func @transform_8(%arg0: i32) -> (i32, i32, i32) {
    %c0_i32 = arith.constant 0 : i32
    %c0_i32_0 = arith.constant 0 : i32
    %c0_i32_1 = arith.constant 0 : i32
    return %arg0, %c0_i32, %c0_i32_0 : i32, i32, i32
  }
  func.func @transform_9(%arg0: i32) -> (i32, i32, i32) {
    %c0_i32 = arith.constant 0 : i32
    %c0_i32_0 = arith.constant 0 : i32
    %c0_i32_1 = arith.constant 0 : i32
    return %arg0, %c0_i32, %c0_i32_0 : i32, i32, i32
  }
}

</mosaic_0001>

<bundles_post_ra>
// kernel: tpu_custom_call.1
= control target key start
LH: loop header
LB: loop body
LE: loop exit
PB: predicated region body
PF: predicated region fallthrough
CT: control target
= control target key end

     0   :  { %s3843_s0 = inlined_call_operand.vmem [shape: bf16[2,128,16], index: 0, kind: input, shape index: {}]   ;;  %s3844_s1 = inlined_call_operand.hbm [shape: bf16[128,128], index: 1, kind: input, shape index: {}]   ;;  %s3845_s2 = inlined_call_operand.vmem [shape: bf16[16,256], index: 2, kind: input, shape index: {}]   ;;  %s3846_s3 = inlined_call_operand.vmem [shape: f32[1,128], index: 3, kind: input, shape index: {}]   ;;  %s3847_s4 = inlined_call_operand.hbm [shape: bf16[4,128,256], index: 4, kind: input, shape index: {}]   ;;  %s3848_s5 = inlined_call_operand.vmem [shape: f32[4,1,128], index: 5, kind: input, shape index: {}]   ;;  %s3849_s6 = inlined_call_operand.vmem [shape: bf16[128,256], index: 6, kind: input, shape index: {}]   ;;  %s3850_s7 = inlined_call_operand.hbm [shape: f32[1,128], index: 7, kind: input, shape index: {}]   ;;  %s3851_s8 = inlined_call_operand.hbm [shape: f32[2,128,128], index: 8, kind: output, shape index: {0}]   ;;  %s3852_s9 = inlined_call_operand.hbm [shape: f32[2,128,128], index: 9, kind: output, shape index: {1}]  }
   0x1   :  { %3854 = sst [smem:[#allocation17_spill]] %s3844_s1 }
   0x2   :  { %3855 = sst [smem:[#allocation18_spill]] %s3847_s4 }
   0x3   :  { %15 = vsyncpa [#allocation3], 0 }
   0x4   :  { %16 = vsyncpa [#allocation6], 0 }
   0x5   :  { %17 = vsyncpa [#allocation4], 0 }
   0x6   :  { %19 = vsyncpa [#allocation4 + $0x1], 0 }
   0x7   :  { %20 = vsyncpa [#allocation10], 0 }
   0x8   :  { %22 = vsyncpa [#allocation10 + $0x1], 0  ;;  %s2987_s30 = smov 0   ;;  %s2989_s10 = smov 0  }
   0x9   :  { %s2991_s11 = smov 0   ;;  %s2993_s12 = smov 0  }
   0xa LB: > { %3856 = sst [smem:[#allocation15_spill]] %s2854_s11  ;;  %s3008_s13 = sadd.s32 4294967295, %s2858_s12   ;;  %s2858_s12 = sphi %s2993_s12, %s3901_s12   ;;  %s2854_s11 = sphi %s2991_s11, %s3898_s11   ;;  %s2850_s10 = sphi %s2989_s10, %s3900_s10   ;;  %s2846_s30 = sphi %s2987_s30, %s3899_s30  }
   0xb   : > { %s1932_s14 = sadd.s32 4294967294, %s2858_s12   ;;  %s3012_s15 = sadd.s32 1, %s2858_s12  }
   0xc   : > { %s208_s16 = sadd.s32 1, %s2854_s11  ;;  %s205_s17 = ssub.s32 %s2858_s12, %s3012_s15 }
   0xd   : > { %p218_p0 = scmp.ne.s32.totalorder %s2854_s11, %s2850_s10  ;;  %p206_p1 = scmp.eq.s32.totalorder %s205_s17, 0 }
   0xe   : > { %p219_p2 = scmp.eq.s32.totalorder %s3008_s13, 1  ;;  %p224_p3 = scmp.ne.s32.totalorder %s2850_s10, %s2846_s30 }
   0xf   : > { %p225_p4 = scmp.eq.s32.totalorder %s1932_s14, 1  ;;  %p1933_p7 = scmp.ge.s32.totalorder %s2858_s12, 1 }
  0x10   : > { %s3023_s18 = scalar_select %p206_p1, %s2854_s11, %s208_s16  }
  0x11   : > { %p3025_p5 = por %p219_p2, %p218_p0  ;;  %p3029_p6 = por %p225_p4, %p224_p3 }
  0x12   : > { %3857 = sst [smem:[#allocation16_spill]] %s3023_s18  ;;  %p258_p8 = scmp.lt.s32.totalorder %s2858_s12, 3 }
  0x13   : > { %p2410_p9 = scmp.eq.s32.totalorder %s3008_s13, 0  ;;  %s3861_s4 = sld [smem:[#allocation18_spill]] }
  0x14   : > { %p3036_p10 = pnand %p1933_p7, %p258_p8  ;;  %s2928_s25 = smov [#allocation5]  }
  0x15   : > { %s291_s26 = sshll.u32 %s2928_s25, 4  ;;  %s3863_s1 = sld [smem:[#allocation17_spill]]  ;;  %s292_s26 = int_to_ptr.vmem [resolvable:$true] %s291_s26 }
  0x16   : > { %p2393_p11 = pneg %p3036_p10  ;;  %s2929_s16 = smov 128  }
  0x17   : > { %s2930_s17 = smov 8   ;;  %s2931_s22 = smov [#allocation2]  }
  0x18   : > { %p3047_p12 = pnand %p2410_p9, %p2393_p11  ;;  %s271_s23 = sshll.u32 %s2931_s22, 4  ;;  %s272_s23 = int_to_ptr.vmem [resolvable:$true] %s271_s23 }
  0x19   : > { %s289_s24 = sshll.u32 %s3861_s4, 4  ;;  %s2932_s25 = smov 64   ;;  %s290_s24 = int_to_ptr.hbm [resolvable:$true] %s289_s24 }
  0x1a   : > { %2399 = dma.hbm_to_vmem [thread:$0]  (!%p3047_p12), %s290_s24, 8192, %s292_s26, [#allocation6], %s2929_s16, %s2929_s16, %s2930_s17  }
  0x1b   : > { %s269_s14 = sshll.u32 %s3863_s1, 4  ;;  %s2933_s4 = smov 4   ;;  %s270_s14 = int_to_ptr.hbm [resolvable:$true] %s269_s14 }
  0x1c   : > { %2396 = dma.hbm_to_vmem [thread:$0]  (!%p3047_p12), %s270_s14, 1024, %s272_s23, [#allocation3], %s2932_s25, %s2932_s25, %s2933_s4  }
  0x1d   : > { %s310_s28 = sshll.u32 %s3850_s7, 4  ;;  %s2934_s29 = smov [#allocation7]   ;;  %s311_s28 = int_to_ptr.hbm [resolvable:$true] %s310_s28 }
  0x1e   : > { %s312_s1 = sshll.u32 %s2934_s29, 4  ;;  %333 = sbr.rel (%p3036_p10) target bundleno = 1989 (0x7c5), region = 52  ;;  %s313_s1 = int_to_ptr.vmem [resolvable:$true] %s312_s1 }
  0x1f   : > { %2402 = dma.hbm_to_vmem [thread:$0]  (!%p3047_p12), %s311_s28, 16, %s313_s1, [#allocation6]  }
  0x23   : > { %2829 = dma.done.wait (%p2410_p9), [#allocation3], 1024  }
  0x24   : > { %2831 = vsyncadd (%p2410_p9), [#allocation3], 4294966272 }
  0x25   : > { %2833 = dma.done.wait (%p2410_p9), [#allocation6], 8208  }
  0x26   : > { %2835 = vsyncadd (%p2410_p9), [#allocation6], 4294959088  ;;  %s3074_s4 = sand.u32 1, %s2850_s10   ;;  %p385_p13 = scmp.lt.s32.totalorder %s3008_s13, 1  ;;  %v1980_v0 = vld [vmem:[%s3845_s2] sm:$0xf] }
  0x27   : > { %s1942_s1 = sshll.u32 %s3074_s4, 7  ;;  %v2275_v1 = vld [vmem:[%s3845_s2 + $0x4] sm:$0xf0]  ;;  %vm476_vm0 = vcmask 130048   ;;  %v2274_v26 = vld [vmem:[%s3845_s2 + $0x4] sm:$0xf] }
  0x28   : > { %s386_s11 = scalar_select %p385_p13, %s3008_s13, 1  ;;  %v1981_v2 = vor.u32 %v2275_v1, %v1980_v0  ;;  %v1982_v27 = vld [vmem:[%s3845_s2 + $0x8] sm:$0xf0]  ;;  %v3109_v38 = vld [vmem:[#allocation2] sm:$0xff]  ;;  %v3117_v40 = vld [vmem:[#allocation2 + $0x30] sm:$0xff] }
  0x29   : > { %v1985_v28 = vor.u32 %v2274_v26, %v1982_v27  ;;  %v3113_v39 = vld [vmem:[#allocation2 + $0x8] sm:$0xff]  ;;  %v3120_v41 = vld [vmem:[#allocation2 + $0x10] sm:$0xff]  ;;  %v3124_v42 = vld [vmem:[#allocation2 + $0x38] sm:$0xff]  ;;  %s3177_s21 = scalar_lea.vmem [#allocation9], %s1942_s1 }
  0x2a   : > { %s2257_s18 = sshll.u32 %s386_s11, 6  ;;  %508 = vmatpush.bf16.msra.mxu0 %v1981_v2  ;;  %v3127_v43 = vld [vmem:[#allocation2 + $0x18] sm:$0xff]  ;;  %v3132_v45 = vld [vmem:[#allocation2 + $0x20] sm:$0xff]  ;;  %v3135_v48 = vld [vmem:[#allocation2 + $0x28] sm:$0xff] }
  0x2b   : > { %s389_s26 = scalar_lea.vmem %s3843_s0, %s2257_s18  ;;  %557 = vmatpush.bf16.msra.mxu1 %v1985_v28  ;;  %v3141_v56 = vld [vmem:[%s3846_s3] ss:$0 sm:$0xff]  ;;  %s3173_s18 = scalar_lea.vmem [#allocation8], %s1942_s1 }
  0x2c   : > { %v2266_v3 = vld [vmem:[%s389_s26] sm:$0xff]  ;;  %v2267_v4 = vld [vmem:[%s389_s26 + $0x8] sm:$0xff]  ;;  %v2268_v5 = vld [vmem:[%s389_s26 + $0x10] sm:$0xff]  ;;  %s3219_s1 = smov 0  }
  0x2d   : > { %1986 = vmatmul.msk.bf16.vlgmr.msra.gmra.mxu0 %vm476_vm0, %v2266_v3  ;;  %v2269_v6 = vld [vmem:[%s389_s26 + $0x18] sm:$0xff]  ;;  %v2270_v7 = vld [vmem:[%s389_s26 + $0x20] sm:$0xff]  ;;  %v2271_v8 = vld [vmem:[%s389_s26 + $0x28] sm:$0xff] }
  0x2e   : > { %v2272_v9 = vld [vmem:[%s389_s26 + $0x30] sm:$0xff]  ;;  %v3095_v10 = vld [vmem:[%s389_s26 + $0x38] sm:$0xff]  ;;  %1994 = vmatmul.msk.bf16.vlgmr.msra.gmra.mxu1 %vm476_vm0, %v2266_v3 }
  0x3d   : > { %1987 = vmatmul.msk.bf16.gmra.mxu0 %vm476_vm0, %v2267_v4 }
  0x3e   : > { %1995 = vmatmul.msk.bf16.gmra.mxu1 %vm476_vm0, %v2267_v4 }
  0x4d   : > { %1988 = vmatmul.msk.bf16.gmra.mxu0 %vm476_vm0, %v2268_v5 }
  0x4e   : > { %1996 = vmatmul.msk.bf16.gmra.mxu1 %vm476_vm0, %v2268_v5 }
  0x5d   : > { %1989 = vmatmul.msk.bf16.gmra.mxu0 %vm476_vm0, %v2269_v6 }
  0x5e   : > { %1997 = vmatmul.msk.bf16.gmra.mxu1 %vm476_vm0, %v2269_v6 }
  0x6d   : > { %1990 = vmatmul.msk.bf16.gmra.mxu0 %vm476_vm0, %v2270_v7 }
  0x6e   : > { %1998 = vmatmul.msk.bf16.gmra.mxu1 %vm476_vm0, %v2270_v7 }
  0x7d   : > { %1991 = vmatmul.msk.bf16.gmra.mxu0 %vm476_vm0, %v2271_v8 }
  0x7e   : > { %1999 = vmatmul.msk.bf16.gmra.mxu1 %vm476_vm0, %v2271_v8 }
  0x8d   : > { %1992 = vmatmul.msk.bf16.gmra.mxu0 %vm476_vm0, %v2272_v9 }
  0x8e   : > { %2000 = vmatmul.msk.bf16.gmra.mxu1 %vm476_vm0, %v2272_v9 }
  0x9d   : > { %1993 = vmatmul.msk.bf16.gmra.mxu0 %vm476_vm0, %v3095_v10 }
  0x9e   : > { %2001 = vmatmul.msk.bf16.gmra.mxu1 %vm476_vm0, %v3095_v10 }
  0xaa   : > { %v510_v11 = vpop.f32.mrf.mxu0 }
  0xab   : > { %v559_v44 = vpop.f32.mrf.mxu1 }
  0xb2   : > { %v512_v12 = vpop.f32.mrf.mxu0 }
  0xb3   : > { %v599_v13 = vpack.c.bf16 %v512_v12, %v510_v11  ;;  %v561_v46 = vpop.f32.mrf.mxu1 }
  0xba   : > { %v515_v14 = vpop.f32.mrf.mxu0 }
  0xbb   : > { %v564_v47 = vpop.f32.mrf.mxu1 }
  0xc2   : > { %v517_v15 = vpop.f32.mrf.mxu0 }
  0xc3   : > { %v600_v16 = vpack.c.bf16 %v517_v15, %v515_v14  ;;  %v566_v49 = vpop.f32.mrf.mxu1 }
  0xca   : > { %v520_v17 = vpop.f32.mrf.mxu0 }
  0xcb   : > { %v569_v50 = vpop.f32.mrf.mxu1 }
  0xd2   : > { %v522_v18 = vpop.f32.mrf.mxu0 }
  0xd3   : > { %v601_v19 = vpack.c.bf16 %v522_v18, %v520_v17  ;;  %v571_v51 = vpop.f32.mrf.mxu1 }
  0xda   : > { %v525_v20 = vpop.f32.mrf.mxu0 }
  0xdb   : > { %v574_v52 = vpop.f32.mrf.mxu1 }
  0xe2   : > { %v527_v21 = vpop.f32.mrf.mxu0 }
  0xe3   : > { %v602_v22 = vpack.c.bf16 %v527_v21, %v525_v20  ;;  %v576_v53 = vpop.f32.mrf.mxu1 }
  0xea   : > { %v530_v23 = vpop.f32.mrf.mxu0 }
  0xeb   : > { %v579_v54 = vpop.f32.mrf.mxu1 }
  0xf2   : > { %v532_v24 = vpop.f32.mrf.mxu0 }
  0xf3   : > { %v603_v37 = vpack.c.bf16 %v532_v24, %v530_v23  ;;  %v581_v55 = vpop.f32.mrf.mxu1 }
  0xfa   : > { %v535_v25 = vpop.f32.mrf.mxu0 }
  0xfb   : > { %v584_v61 = vpop.f32.mrf.mxu1 }
 0x102   : > { %v537_v29 = vpop.f32.mrf.mxu0 }
 0x103   : > { %v604_v36 = vpack.c.bf16 %v537_v29, %v535_v25  ;;  %v586_v2 = vpop.f32.mrf.mxu1 }
 0x10a   : > { %v540_v30 = vpop.f32.mrf.mxu0 }
 0x10b   : > { %v589_v7 = vpop.f32.mrf.mxu1 }
 0x112   : > { %v542_v31 = vpop.f32.mrf.mxu0 }
 0x113   : > { %v605_v35 = vpack.c.bf16 %v542_v31, %v540_v30  ;;  %v591_v14 = vpop.f32.mrf.mxu1 }
 0x11a   : > { %v545_v32 = vpop.f32.mrf.mxu0 }
 0x11b   : > { %v594_v25 = vpop.f32.mrf.mxu1 }
 0x122   : > { %v547_v33 = vpop.f32.mrf.mxu0 }
 0x123   : > { %v606_v34 = vpack.c.bf16 %v547_v33, %v545_v32  ;;  %v596_v32 = vpop.f32.mrf.mxu1 }
 0x125   : > { %655 = vmatpush.bf16.msra.mxu2 %v606_v34  ;;  %2329 = vmatpush.bf16.msra.mxu3 %v606_v34 }
 0x129   : > { %656 = vmatpush.bf16.msra.mxu2 %v605_v35  ;;  %2330 = vmatpush.bf16.msra.mxu3 %v605_v35 }
 0x12d   : > { %657 = vmatpush.bf16.msra.mxu2 %v604_v36  ;;  %2331 = vmatpush.bf16.msra.mxu3 %v604_v36 }
 0x131   : > { %658 = vmatpush.bf16.msra.mxu2 %v603_v37  ;;  %2332 = vmatpush.bf16.msra.mxu3 %v603_v37 }
 0x135   : > { %659 = vmatpush.bf16.msra.mxu2 %v602_v22  ;;  %2333 = vmatpush.bf16.msra.mxu3 %v602_v22 }
 0x139   : > { %660 = vmatpush.bf16.msra.mxu2 %v601_v19  ;;  %2334 = vmatpush.bf16.msra.mxu3 %v601_v19 }
 0x13d   : > { %661 = vmatpush.bf16.msra.mxu2 %v600_v16  ;;  %2335 = vmatpush.bf16.msra.mxu3 %v600_v16 }
 0x141   : > { %662 = vmatpush.bf16.msra.mxu2 %v599_v13  ;;  %2336 = vmatpush.bf16.msra.mxu3 %v599_v13 }
 0x144   : > { %663 = vmatmul.bf16.vlgmr.msra.gmra.mxu2 %v3109_v38  ;;  %693 = vmatmul.bf16.vlgmr.msra.gmra.mxu3 %v3117_v40 }
 0x154   : > { %668 = vmatmul.bf16.gmra.mxu2 %v3113_v39  ;;  %698 = vmatmul.bf16.gmra.mxu3 %v3124_v42 }
 0x164   : > { %673 = vmatmul.bf16.gmra.mxu2 %v3120_v41 }
 0x174   : > { %678 = vmatmul.bf16.gmra.mxu2 %v3127_v43 }
 0x184   : > { %683 = vmatmul.bf16.gmra.mxu2 %v3132_v45 }
 0x194   : > { %688 = vmatmul.bf16.gmra.mxu2 %v3135_v48 }
 0x1c7   : > { %v664_v57 = vpop.f32.mrf.mxu2  ;;  %v694_v9 = vpop.f32.mrf.mxu3 }
 0x1c8   : > { %v665_v58 = vadd.f32 %v664_v57, %v559_v44  ;;  %v695_v13 = vadd.f32 %v694_v9, %v589_v7 }
 0x1ca   : > { %v3144_v59 = vadd.f32 %v3141_v56, %v665_v58  ;;  %v719_v15 = vadd.f32 %v3141_v56, %v695_v13 }
 0x1cc   : > { %v723_v60 = vmax.f32 %v3144_v59, 0.0   ;;  %v735_v19 = vmax.f32 %v719_v15, 0.0  }
 0x1cf   : > { %v666_v62 = vpop.f32.mrf.mxu2  ;;  %v696_v17 = vpop.f32.mrf.mxu3 }
 0x1d0   : > { %v667_v63 = vadd.f32 %v666_v62, %v561_v46  ;;  %v697_v20 = vadd.f32 %v696_v17, %v591_v14 }
 0x1d2   : > { %v3148_v0 = vadd.f32 %v3141_v56, %v667_v63  ;;  %v720_v22 = vadd.f32 %v3141_v56, %v697_v20 }
 0x1d4   : > { %v724_v1 = vmax.f32 %v3148_v0, 0.0   ;;  %v736_v24 = vmax.f32 %v720_v22, 0.0  }
 0x1d7   : > { %v669_v3 = vpop.f32.mrf.mxu2  ;;  %v699_v27 = vpop.f32.mrf.mxu3 }
 0x1d8   : > { %v670_v4 = vadd.f32 %v669_v3, %v564_v47  ;;  %v700_v31 = vadd.f32 %v699_v27, %v594_v25 }
 0x1da   : > { %v3152_v5 = vadd.f32 %v3141_v56, %v670_v4  ;;  %v721_v33 = vadd.f32 %v3141_v56, %v700_v31 }
 0x1dc   : > { %v725_v6 = vmax.f32 %v3152_v5, 0.0   ;;  %v737_v37 = vmax.f32 %v721_v33, 0.0  }
 0x1df   : > { %v671_v8 = vpop.f32.mrf.mxu2  ;;  %v701_v35 = vpop.f32.mrf.mxu3 }
 0x1e0   : > { %v672_v10 = vadd.f32 %v671_v8, %v566_v49  ;;  %v702_v44 = vadd.f32 %v701_v35, %v596_v32 }
 0x1e2   : > { %v3156_v11 = vadd.f32 %v3141_v56, %v672_v10  ;;  %v722_v47 = vadd.f32 %v3141_v56, %v702_v44 }
 0x1e4   : > { %v726_v12 = vmax.f32 %v3156_v11, 0.0  }
 0x1e7   : > { %v674_v16 = vpop.f32.mrf.mxu2 }
 0x1e8   : > { %v675_v18 = vadd.f32 %v674_v16, %v569_v50  ;;  %v738_v50 = vmax.f32 %v722_v47, 0.0  }
 0x1ea   : > { %v711_v21 = vadd.f32 %v3141_v56, %v675_v18 }
 0x1ec   : > { %v727_v23 = vmax.f32 %v711_v21, 0.0  }
 0x1ef   : > { %v676_v26 = vpop.f32.mrf.mxu2 }
 0x1f0   : > { %v677_v28 = vadd.f32 %v676_v26, %v571_v51 }
 0x1f2   : > { %v712_v29 = vadd.f32 %v3141_v56, %v677_v28 }
 0x1f4   : > { %v728_v30 = vmax.f32 %v712_v29, 0.0  }
 0x1f7   : > { %v679_v34 = vpop.f32.mrf.mxu2 }
 0x1f8   : > { %v680_v36 = vadd.f32 %v679_v34, %v574_v52 }
 0x1fa   : > { %v713_v46 = vadd.f32 %v3141_v56, %v680_v36 }
 0x1fc   : > { %v729_v49 = vmax.f32 %v713_v46, 0.0  }
 0x1ff   : > { %v681_v57 = vpop.f32.mrf.mxu2 }
 0x200   : > { %v682_v51 = vadd.f32 %v681_v57, %v576_v53 }
 0x202   : > { %v714_v58 = vadd.f32 %v3141_v56, %v682_v51 }
 0x204   : > { %v730_v62 = vmax.f32 %v714_v58, 0.0  }
 0x207   : > { %v684_v63 = vpop.f32.mrf.mxu2 }
 0x208   : > { %v685_v3 = vadd.f32 %v684_v63, %v579_v54 }
 0x20a   : > { %v715_v4 = vadd.f32 %v3141_v56, %v685_v3 }
 0x20c   : > { %v731_v52 = vmax.f32 %v715_v4, 0.0  }
 0x20f   : > { %v686_v7 = vpop.f32.mrf.mxu2 }
 0x210   : > { %v687_v8 = vadd.f32 %v686_v7, %v581_v55 }
 0x212   : > { %v716_v9 = vadd.f32 %v3141_v56, %v687_v8 }
 0x214   : > { %v732_v10 = vmax.f32 %v716_v9, 0.0  }
 0x217   : > { %v689_v13 = vpop.f32.mrf.mxu2 }
 0x218   : > { %v690_v14 = vadd.f32 %v689_v13, %v584_v61 }
 0x21a   : > { %v717_v15 = vadd.f32 %v3141_v56, %v690_v14 }
 0x21c   : > { %v733_v53 = vmax.f32 %v717_v15, 0.0  }
 0x21f   : > { %v691_v16 = vpop.f32.mrf.mxu2 }
 0x220   : > { %v692_v17 = vadd.f32 %v691_v16, %v586_v2 }
 0x222   : > { %v718_v18 = vadd.f32 %v3141_v56, %v692_v17 }
 0x224   : > { %v734_v20 = vmax.f32 %v718_v18, 0.0  }
 0x225 LB: >> { %s2277_s24 = sshll.u32 %s2926_s1, 8  ;;  %v3293_v47 = vpack.c.bf16 %v2886_v10, %v2890_v52  ;;  %v3297_v57 = vpack.c.bf16 %v2918_v1, %v2922_v60  ;;  %v3303_v51 = vpack.c.bf16 %v2878_v20, %v2882_v53  ;;  %v3307_v58 = vpack.c.bf16 %v2910_v12, %v2914_v6  ;;  %s2034_s27 = sshll.u32 %s2926_s1, 1  ;;  %s2926_s1 = sphi %s3219_s1, %s744_s1   ;;  %v2922_v60 = vphi %v723_v60, %v3896_v60   ;;  %v2918_v1 = vphi %v724_v1, %v3895_v1   ;;  %v2914_v6 = vphi %v725_v6, %v3894_v6   ;;  %v2910_v12 = vphi %v726_v12, %v3893_v12   ;;  %v2906_v23 = vphi %v727_v23, %v3892_v23   ;;  %v2902_v30 = vphi %v728_v30, %v3891_v30   ;;  %v2898_v49 = vphi %v729_v49, %v3890_v49   ;;  %v2894_v62 = vphi %v730_v62, %v3889_v62   ;;  %v2890_v52 = vphi %v731_v52, %v3888_v52   ;;  %v2886_v10 = vphi %v732_v10, %v3887_v10   ;;  %v2882_v53 = vphi %v733_v53, %v3886_v53   ;;  %v2878_v20 = vphi %v734_v20, %v3885_v20   ;;  %v2874_v19 = vphi %v735_v19, %v3884_v19   ;;  %v2870_v24 = vphi %v736_v24, %v3883_v24   ;;  %v2866_v37 = vphi %v737_v37, %v3882_v37   ;;  %v2862_v50 = vphi %v738_v50, %v3881_v50  }
 0x226   : >> { %s3273_s26 = scalar_lea.vmem [#allocation5], %s2277_s24  ;;  %v3313_v63 = vpack.c.bf16 %v2870_v24, %v2874_v19  ;;  %v3317_v3 = vpack.c.bf16 %v2902_v30, %v2906_v23  ;;  %v3323_v4 = vpack.c.bf16 %v2862_v50, %v2866_v37  ;;  %v3327_v7 = vpack.c.bf16 %v2894_v62, %v2898_v49  ;;  %s3367_s17 = scalar_lea.vmem %s3848_s5, %s2034_s27 }
 0x227   : >> { %v2095_v54 = vld [vmem:[%s3273_s26 + $0x70] sm:$0xf]  ;;  %v2293_v55 = vld [vmem:[%s3273_s26 + $0x74] sm:$0xf0]  ;;  %v2087_v56 = vld [vmem:[%s3273_s26 + $0x60] sm:$0xf] }
 0x228   : >> { %v2096_v59 = vor.u32 %v2293_v55, %v2095_v54  ;;  %v2291_v61 = vld [vmem:[%s3273_s26 + $0x64] sm:$0xf0]  ;;  %v2079_v2 = vld [vmem:[%s3273_s26 + $0x50] sm:$0xf]  ;;  %v2289_v5 = vld [vmem:[%s3273_s26 + $0x54] sm:$0xf0] }
 0x229   : >> { %v2088_v0 = vor.u32 %v2291_v61, %v2087_v56  ;;  %v2080_v11 = vor.u32 %v2289_v5, %v2079_v2  ;;  %v2071_v21 = vld [vmem:[%s3273_s26 + $0x40] sm:$0xf]  ;;  %v2287_v22 = vld [vmem:[%s3273_s26 + $0x44] sm:$0xf0]  ;;  %v2063_v26 = vld [vmem:[%s3273_s26 + $0x30] sm:$0xf] }
 0x22a   : >> { %2337 = vmatpush.bf16.msra.mxu2 %v2096_v59  ;;  %871 = vmatpush.bf16.msra.mxu0 %v2096_v59  ;;  %v2072_v25 = vor.u32 %v2287_v22, %v2071_v21  ;;  %v2285_v27 = vld [vmem:[%s3273_s26 + $0x34] sm:$0xf0]  ;;  %v2055_v29 = vld [vmem:[%s3273_s26 + $0x20] sm:$0xf]  ;;  %v2283_v31 = vld [vmem:[%s3273_s26 + $0x24] sm:$0xf0] }
 0x22b   : >> { %v2064_v28 = vor.u32 %v2285_v27, %v2063_v26  ;;  %v2056_v32 = vor.u32 %v2283_v31, %v2055_v29  ;;  %v2047_v33 = vld [vmem:[%s3273_s26 + $0x10] sm:$0xf]  ;;  %v2281_v34 = vld [vmem:[%s3273_s26 + $0x14] sm:$0xf0]  ;;  %v2039_v36 = vld [vmem:[%s3273_s26] sm:$0xf] }
 0x22c   : >> { %v2048_v35 = vor.u32 %v2281_v34, %v2047_v33  ;;  %v2279_v44 = vld [vmem:[%s3273_s26 + $0x4] sm:$0xf0]  ;;  %v2292_v17 = vld [vmem:[%s3273_s26 + $0x74] sm:$0xf]  ;;  %v2097_v18 = vld [vmem:[%s3273_s26 + $0x78] sm:$0xf0] }
 0x22d   : >> { %v2040_v46 = vor.u32 %v2279_v44, %v2039_v36  ;;  %v2100_v54 = vor.u32 %v2292_v17, %v2097_v18  ;;  %v2290_v56 = vld [vmem:[%s3273_s26 + $0x64] sm:$0xf]  ;;  %v2089_v59 = vld [vmem:[%s3273_s26 + $0x68] sm:$0xf0]  ;;  %v2288_v2 = vld [vmem:[%s3273_s26 + $0x54] sm:$0xf] }
 0x22e   : >> { %2338 = vmatpush.bf16.msra.mxu2 %v2088_v0  ;;  %872 = vmatpush.bf16.msra.mxu0 %v2088_v0  ;;  %v2092_v61 = vor.u32 %v2290_v56, %v2089_v59  ;;  %v2081_v5 = vld [vmem:[%s3273_s26 + $0x58] sm:$0xf0]  ;;  %v2286_v22 = vld [vmem:[%s3273_s26 + $0x44] sm:$0xf]  ;;  %v2284_v27 = vld [vmem:[%s3273_s26 + $0x34] sm:$0xf] }
 0x22f   : >> { %920 = vmatpush.bf16.msra.mxu1 %v2100_v54  ;;  %2345 = vmatpush.bf16.msra.mxu3 %v2100_v54  ;;  %v2282_v33 = vld [vmem:[%s3273_s26 + $0x24] sm:$0xf]  ;;  %v2057_v34 = vld [vmem:[%s3273_s26 + $0x28] sm:$0xf0]  ;;  %v2280_v36 = vld [vmem:[%s3273_s26 + $0x14] sm:$0xf] }
 0x230   : >> { %v2049_v44 = vld [vmem:[%s3273_s26 + $0x18] sm:$0xf0]  ;;  %v2278_v54 = vld [vmem:[%s3273_s26 + $0x4] sm:$0xf]  ;;  %v2041_v56 = vld [vmem:[%s3273_s26 + $0x8] sm:$0xf0] }
 0x231   : >> { %v2044_v59 = vor.u32 %v2278_v54, %v2041_v56  ;;  %v2301_v54 = vld [vmem:[%s3273_s26 + $0xb4] sm:$0xf]  ;;  %s744_s1 = sadd.s32 1, %s2926_s1  }
 0x232   : >> { %2339 = vmatpush.bf16.msra.mxu2 %v2080_v11  ;;  %873 = vmatpush.bf16.msra.mxu0 %v2080_v11  ;;  %v2084_v11 = vor.u32 %v2288_v2, %v2081_v5  ;;  %p3511_p0 = scmp.ge.s32.totalorder %s744_s1, 2  }
 0x233   : >> { %921 = vmatpush.bf16.msra.mxu1 %v2092_v61  ;;  %2346 = vmatpush.bf16.msra.mxu3 %v2092_v61  ;;  %s2327_s22 = sshll.u32 (%p3511_p0), %s3008_s13, 7  ;;  %s1739_s29 = sshll.u32 (%p3511_p0), %s3177_s21, 4  ;;  %s1740_s29 = int_to_ptr.vmem [resolvable:$true] %s1739_s29 }
 0x234   : > { %s1738_s28 = scalar_lea.hbm (%p3511_p0), %s3852_s9, %s2327_s22  ;;  %s1710_s24 = scalar_lea.sflag (%p3511_p0), [#allocation10], %s3074_s4 }
 0x235   : > { %s1741_s11 = sshll.u32 (%p3511_p0), %s1738_s28, 4  ;;  %s2708_s16 = scalar_lea.hbm (%p3511_p0), %s3852_s9, 256  ;;  %s1742_s11 = int_to_ptr.hbm [resolvable:$true] %s1741_s11 }
 0x236   : >> { %2340 = vmatpush.bf16.msra.mxu2 %v2072_v25  ;;  %874 = vmatpush.bf16.msra.mxu0 %v2072_v25  ;;  %v2073_v25 = vld [vmem:[%s3273_s26 + $0x48] sm:$0xf0]  ;;  %s2702_s1 = sshra.s32 (%p3511_p0), %s1742_s11, 4  ;;  %s2703_s1 = int_to_ptr.hbm [resolvable:$true] %s2702_s1 }
 0x237   : >> { %922 = vmatpush.bf16.msra.mxu1 %v2084_v11  ;;  %2347 = vmatpush.bf16.msra.mxu3 %v2084_v11  ;;  %v2076_v26 = vor.u32 %v2286_v22, %v2073_v25  ;;  %p2709_p4 = scmp.lt.s32.totalorder (%p3511_p0), %s2703_s1, %s3852_s9 }
 0x23a   : >> { %2341 = vmatpush.bf16.msra.mxu2 %v2064_v28  ;;  %875 = vmatpush.bf16.msra.mxu0 %v2064_v28  ;;  %v2065_v28 = vld [vmem:[%s3273_s26 + $0x38] sm:$0xf0] }
 0x23b   : >> { %923 = vmatpush.bf16.msra.mxu1 %v2076_v26  ;;  %2348 = vmatpush.bf16.msra.mxu3 %v2076_v26  ;;  %v2068_v29 = vor.u32 %v2284_v27, %v2065_v28  ;;  %v2305_v28 = vld [vmem:[%s3273_s26 + $0xd4] sm:$0xf] }
 0x23e   : >> { %2342 = vmatpush.bf16.msra.mxu2 %v2056_v32  ;;  %876 = vmatpush.bf16.msra.mxu0 %v2056_v32 }
 0x23f   : >> { %924 = vmatpush.bf16.msra.mxu1 %v2068_v29  ;;  %2349 = vmatpush.bf16.msra.mxu3 %v2068_v29  ;;  %v2165_v29 = vld [vmem:[%s3273_s26 + $0xd8] sm:$0xf0] }
 0x242   : >> { %2343 = vmatpush.bf16.msra.mxu2 %v2048_v35  ;;  %877 = vmatpush.bf16.msra.mxu0 %v2048_v35  ;;  %v2060_v35 = vor.u32 %v2282_v33, %v2057_v34  ;;  %v2155_v33 = vld [vmem:[%s3273_s26 + $0xc0] sm:$0xf]  ;;  %v2304_v34 = vld [vmem:[%s3273_s26 + $0xc4] sm:$0xf0] }
 0x244   : >> { %925 = vmatpush.bf16.msra.mxu1 %v2060_v35  ;;  %2350 = vmatpush.bf16.msra.mxu3 %v2060_v35  ;;  %v2303_v35 = vld [vmem:[%s3273_s26 + $0xc4] sm:$0xf] }
 0x246   : >> { %2344 = vmatpush.bf16.msra.mxu2 %v2040_v46  ;;  %878 = vmatpush.bf16.msra.mxu0 %v2040_v46  ;;  %v2052_v46 = vor.u32 %v2280_v36, %v2049_v44  ;;  %v2157_v36 = vld [vmem:[%s3273_s26 + $0xc8] sm:$0xf0]  ;;  %v2156_v44 = vor.u32 %v2304_v34, %v2155_v33 }
 0x248   : >> { %926 = vmatpush.bf16.msra.mxu1 %v2052_v46  ;;  %2351 = vmatpush.bf16.msra.mxu3 %v2052_v46  ;;  %v2160_v46 = vor.u32 %v2303_v35, %v2157_v36 }
 0x249   : >> { %899 = vmatmul.bf16.vlgmr.msra.gmra.mxu2 %v3293_v47  ;;  %879 = vmatmul.bf16.vlgmr.msra.gmra.mxu0 %v3297_v57 }
 0x24c   : >> { %927 = vmatpush.bf16.msra.mxu1 %v2044_v59  ;;  %2352 = vmatpush.bf16.msra.mxu3 %v2044_v59  ;;  %v2149_v59 = vld [vmem:[%s3273_s26 + $0xb8] sm:$0xf0] }
 0x24f   : >> { %928 = vmatmul.bf16.vlgmr.msra.gmra.mxu1 %v3297_v57  ;;  %948 = vmatmul.bf16.vlgmr.msra.gmra.mxu3 %v3293_v47 }
 0x259   : >> { %904 = vmatmul.bf16.gmra.mxu2 %v3303_v51  ;;  %884 = vmatmul.bf16.gmra.mxu0 %v3307_v58 }
 0x25f   : >> { %933 = vmatmul.bf16.gmra.mxu1 %v3307_v58  ;;  %953 = vmatmul.bf16.gmra.mxu3 %v3303_v51  ;;  %v2179_v51 = vld [vmem:[%s3273_s26 + $0xf0] sm:$0xf] }
 0x269   : >> { %909 = vmatmul.bf16.gmra.mxu2 %v3313_v63  ;;  %889 = vmatmul.bf16.gmra.mxu0 %v3317_v3 }
 0x26f   : >> { %938 = vmatmul.bf16.gmra.mxu1 %v3317_v3  ;;  %958 = vmatmul.bf16.gmra.mxu3 %v3313_v63  ;;  %v2310_v63 = vld [vmem:[%s3273_s26 + $0xf4] sm:$0xf0]  ;;  %v2309_v3 = vld [vmem:[%s3273_s26 + $0xf4] sm:$0xf] }
 0x279   : >> { %914 = vmatmul.bf16.gmra.mxu2 %v3323_v4  ;;  %894 = vmatmul.bf16.gmra.mxu0 %v3327_v7 }
 0x27f   : >> { %943 = vmatmul.bf16.gmra.mxu1 %v3327_v7  ;;  %963 = vmatmul.bf16.gmra.mxu3 %v3323_v4  ;;  %v2180_v7 = vor.u32 %v2310_v63, %v2179_v51  ;;  %v2171_v4 = vld [vmem:[%s3273_s26 + $0xe0] sm:$0xf]  ;;  %v2133_v51 = vld [vmem:[%s3273_s26 + $0x98] sm:$0xf0] }
 0x281   : >> { %1171 = vmatpush.bf16.msrb.mxu3 %v2180_v7  ;;  %v2296_v7 = vld [vmem:[%s3273_s26 + $0x84] sm:$0xf0] }
 0x2c6   : >> { %v3333_v9 = vpop.f32.mrf.mxu0 }
 0x2cc   : >> { %v3331_v8 = vpop.f32.mrf.mxu2 }
 0x2ce   : >> { %v3337_v14 = vpop.f32.mrf.mxu0 }
 0x2cf   : >> { %v969_v58 = vpack.c.bf16 %v3337_v14, %v3333_v9  ;;  %v2308_v9 = vld [vmem:[%s3273_s26 + $0xe4] sm:$0xf0]  ;;  %v2307_v14 = vld [vmem:[%s3273_s26 + $0xe4] sm:$0xf] }
 0x2d4   : >> { %v3335_v13 = vpop.f32.mrf.mxu2 }
 0x2d5   : >> { %v973_v25 = vpack.c.bf16 %v3335_v13, %v3331_v8  ;;  %v2181_v8 = vld [vmem:[%s3273_s26 + $0xf8] sm:$0xf0] }
 0x2d6   : >> { %v3339_v16 = vpop.f32.mrf.mxu0  ;;  %v2184_v13 = vor.u32 %v2309_v3, %v2181_v8  ;;  %v2123_v3 = vld [vmem:[%s3273_s26 + $0x80] sm:$0xf]  ;;  %v2295_v8 = vld [vmem:[%s3273_s26 + $0x84] sm:$0xf] }
 0x2d8   : >> { %1220 = vmatpush.bf16.msrb.mxu0 %v2184_v13 }
 0x2dc   : >> { %v905_v15 = vpop.f32.mrf.mxu2 }
 0x2de   : >> { %v887_v0 = vpop.f32.mrf.mxu0 }
 0x2df   : >> { %v970_v57 = vpack.c.bf16 %v887_v0, %v3339_v16  ;;  %v2172_v16 = vor.u32 %v2308_v9, %v2171_v4  ;;  %v2163_v0 = vld [vmem:[%s3273_s26 + $0xd0] sm:$0xf]  ;;  %v2124_v4 = vor.u32 %v2296_v7, %v2123_v3  ;;  %v2125_v9 = vld [vmem:[%s3273_s26 + $0x88] sm:$0xf0] }
 0x2e0   : >> { %v2128_v13 = vor.u32 %v2295_v8, %v2125_v9  ;;  %v949_v8 = vpop.f32.mrf.mxu3 }
 0x2e1   : >> { %1172 = vmatpush.bf16.msrb.mxu3 %v2172_v16 }
 0x2e4   : >> { %v907_v55 = vpop.f32.mrf.mxu2 }
 0x2e5   : >> { %v974_v22 = vpack.c.bf16 %v907_v55, %v905_v15  ;;  %v2173_v15 = vld [vmem:[%s3273_s26 + $0xe8] sm:$0xf0] }
 0x2e6   : >> { %v890_v31 = vpop.f32.mrf.mxu0  ;;  %v2176_v55 = vor.u32 %v2307_v14, %v2173_v15  ;;  %v929_v14 = vpop.f32.mrf.mxu1 }
 0x2e8   : >> { %1221 = vmatpush.bf16.msrb.mxu0 %v2176_v55 }
 0x2ec   : >> { %v910_v21 = vpop.f32.mrf.mxu2 }
 0x2ee   : >> { %v892_v18 = vpop.f32.mrf.mxu0  ;;  %v931_v15 = vpop.f32.mrf.mxu1 }
 0x2ef   : >> { %v971_v47 = vpack.c.bf16 %v892_v18, %v890_v31  ;;  %v2302_v18 = vld [vmem:[%s3273_s26 + $0xb4] sm:$0xf0] }
 0x2f4   : >> { %v912_v32 = vpop.f32.mrf.mxu2 }
 0x2f5   : >> { %v975_v11 = vpack.c.bf16 %v912_v32, %v910_v21  ;;  %v2306_v21 = vld [vmem:[%s3273_s26 + $0xd4] sm:$0xf0]  ;;  %v2168_v32 = vor.u32 %v2305_v28, %v2165_v29 }
 0x2f6   : >> { %v895_v5 = vpop.f32.mrf.mxu0  ;;  %v2164_v31 = vor.u32 %v2306_v21, %v2163_v0  ;;  %v3417_v0 = vld [vmem:[%s3367_s17] ss:$0 sm:$0xff]  ;;  %v934_v21 = vpop.f32.mrf.mxu1 }
 0x2f7   : >> { %1222 = vmatpush.bf16.msrb.mxu0 %v2168_v32 }
 0x2f8   : >> { %1173 = vmatpush.bf16.msrb.mxu3 %v2164_v31 }
 0x2fb   : >> { %1223 = vmatpush.bf16.msrb.mxu0 %v2160_v46 }
 0x2fc   : >> { %v915_v17 = vpop.f32.mrf.mxu2  ;;  %1174 = vmatpush.bf16.msrb.mxu3 %v2156_v44 }
 0x2fe   : >> { %v897_v26 = vpop.f32.mrf.mxu0  ;;  %v936_v36 = vpop.f32.mrf.mxu1 }
 0x2ff   : >> { %v972_v27 = vpack.c.bf16 %v897_v26, %v895_v5  ;;  %v2300_v5 = vld [vmem:[%s3273_s26 + $0xa4] sm:$0xf0] }
 0x304   : >> { %v917_v61 = vpop.f32.mrf.mxu2 }
 0x305   : >> { %v976_v2 = vpack.c.bf16 %v917_v61, %v915_v17  ;;  %v2147_v17 = vld [vmem:[%s3273_s26 + $0xb0] sm:$0xf]  ;;  %v2152_v61 = vor.u32 %v2301_v54, %v2149_v59 }
 0x306   : >> { %v2148_v56 = vor.u32 %v2302_v18, %v2147_v17 }
 0x307   : >> { %977 = vmatpush.bf16.msrb.mxu2 %v976_v2  ;;  %1224 = vmatpush.bf16.msrb.mxu0 %v2152_v61  ;;  %v2139_v2 = vld [vmem:[%s3273_s26 + $0xa0] sm:$0xf] }
 0x308   : >> { %1175 = vmatpush.bf16.msrb.mxu3 %v2148_v56  ;;  %v939_v56 = vpop.f32.mrf.mxu1 }
 0x30b   : >> { %978 = vmatpush.bf16.msrb.mxu2 %v975_v11  ;;  %v2299_v11 = vld [vmem:[%s3273_s26 + $0xa4] sm:$0xf] }
 0x30f   : >> { %979 = vmatpush.bf16.msrb.mxu2 %v974_v22  ;;  %v2140_v22 = vor.u32 %v2300_v5, %v2139_v2 }
 0x311   : >> { %1176 = vmatpush.bf16.msrb.mxu3 %v2140_v22  ;;  %v941_v22 = vpop.f32.mrf.mxu1 }
 0x313   : >> { %980 = vmatpush.bf16.msrb.mxu2 %v973_v25  ;;  %v2141_v25 = vld [vmem:[%s3273_s26 + $0xa8] sm:$0xf0] }
 0x314   : >> { %v2144_v26 = vor.u32 %v2299_v11, %v2141_v25 }
 0x316   : >> { %1225 = vmatpush.bf16.msrb.mxu0 %v2144_v26 }
 0x317   : >> { %981 = vmatpush.bf16.msrb.mxu2 %v972_v27  ;;  %v2131_v27 = vld [vmem:[%s3273_s26 + $0x90] sm:$0xf] }
 0x31b   : >> { %982 = vmatpush.bf16.msrb.mxu2 %v971_v47  ;;  %v2298_v47 = vld [vmem:[%s3273_s26 + $0x94] sm:$0xf0] }
 0x31f   : >> { %983 = vmatpush.bf16.msrb.mxu2 %v970_v57  ;;  %v2297_v57 = vld [vmem:[%s3273_s26 + $0x94] sm:$0xf]  ;;  %s2704_s26 = scalar_lea.hbm (%p3511_p0), %s2703_s1, 128 }
 0x320   : >> { %v2136_v63 = vor.u32 %v2297_v57, %v2133_v51  ;;  %p2705_p1 = scmp.ne.s32.totalorder (%p3511_p0), %s2703_s1, %s2704_s26  ;;  %p2710_p7 = scmp.lt.s32.totalorder (%p3511_p0), %s2708_s16, %s2704_s26 }
 0x322   : >> { %1226 = vmatpush.bf16.msrb.mxu0 %v2136_v63  ;;  %v944_v63 = vpop.f32.mrf.mxu1  ;;  %p2706_p2 = pnand (%p3511_p0), %p2705_p1, %p3025_p5  ;;  %p2711_p8 = por (%p3511_p0), %p2710_p7, %p2709_p4 }
 0x323   : >> { %984 = vmatpush.bf16.msrb.mxu2 %v969_v58  ;;  %v2132_v58 = vor.u32 %v2298_v47, %v2131_v27 }
 0x324   : > { %p2707_p3 = pneg (%p3511_p0), %p2706_p2 }
 0x325   : >> { %1177 = vmatpush.bf16.msrb.mxu3 %v2132_v58 }
 0x326   : >> { %985 = vmatmul.bf16.vlgmr.msrb.gmra.mxu2 %v3109_v38  ;;  %1227 = vmatpush.bf16.msrb.mxu0 %v2128_v13  ;;  %p2712_p9 = pnand (%p3511_p0), %p2711_p8, %p2707_p3 }
 0x329   : >> { %1178 = vmatpush.bf16.msrb.mxu3 %v2124_v4 }
 0x32a   : >> { %v946_v9 = vpop.f32.mrf.mxu1 }
 0x336   : >> { %990 = vmatmul.bf16.gmra.mxu2 %v3113_v39 }
 0x346   : >> { %995 = vmatmul.bf16.gmra.mxu2 %v3120_v41 }
 0x356   : >> { %1000 = vmatmul.bf16.gmra.mxu2 %v3127_v43 }
 0x366   : >> { %1005 = vmatmul.bf16.gmra.mxu2 %v3132_v45 }
 0x376   : >> { %1010 = vmatmul.bf16.gmra.mxu2 %v3135_v48 }
 0x386   : >> { %1015 = vmatmul.bf16.gmra.mxu2 %v3117_v40 }
 0x396   : >> { %1020 = vmatmul.bf16.gmra.mxu2 %v3124_v42 }
 0x3a9   : >> { %v986_v16 = vpop.f32.mrf.mxu2 }
 0x3aa   : >> { %v987_v55 = vadd.f32 %v986_v16, %v929_v14 }
 0x3ac   : >> { %v1029_v29 = vadd.f32 %v3417_v0, %v987_v55  ;;  %v951_v55 = vpop.f32.mrf.mxu3 }
 0x3ae   : >> { %v1045_v33 = vmax.f32 %v1029_v29, 0.0 }
 0x3b1   : >> { %v988_v28 = vpop.f32.mrf.mxu2 }
 0x3b2   : >> { %v989_v31 = vadd.f32 %v988_v28, %v931_v15 }
 0x3b4   : >> { %v1030_v32 = vadd.f32 %v3417_v0, %v989_v31 }
 0x3b6   : >> { %v1046_v34 = vmax.f32 %v1030_v32, 0.0 }
 0x3b8   : >> { %v1083_v35 = vpack.c.bf16 %v1046_v34, %v1045_v33  ;;  %v954_v33 = vpop.f32.mrf.mxu3 }
 0x3b9   : >> { %v991_v44 = vpop.f32.mrf.mxu2 }
 0x3ba   : >> { %1179 = vmatmul.bf16.vlgmr.msrb.gmra.mxu3 %v1083_v35  ;;  %1228 = vmatmul.bf16.vlgmr.msrb.gmra.mxu0 %v1083_v35  ;;  %v992_v46 = vadd.f32 %v991_v44, %v934_v21 }
 0x3bc   : >> { %v1031_v18 = vadd.f32 %v3417_v0, %v992_v46 }
 0x3be   : >> { %v1047_v61 = vmax.f32 %v1031_v18, 0.0 }
 0x3c1   : >> { %v993_v17 = vpop.f32.mrf.mxu2 }
 0x3c2   : >> { %v994_v54 = vadd.f32 %v993_v17, %v936_v36 }
 0x3c4   : >> { %v1032_v59 = vadd.f32 %v3417_v0, %v994_v54  ;;  %v956_v54 = vpop.f32.mrf.mxu3 }
 0x3c6   : >> { %v1048_v2 = vmax.f32 %v1032_v59, 0.0 }
 0x3c8   : >> { %v1084_v5 = vpack.c.bf16 %v1048_v2, %v1047_v61 }
 0x3c9   : >> { %v996_v11 = vpop.f32.mrf.mxu2 }
 0x3ca   : >> { %1184 = vmatmul.bf16.gmra.mxu3 %v1084_v5  ;;  %1233 = vmatmul.bf16.gmra.mxu0 %v1084_v5  ;;  %v997_v25 = vadd.f32 %v996_v11, %v939_v56 }
 0x3cc   : >> { %v1033_v27 = vadd.f32 %v3417_v0, %v997_v25  ;;  %v959_v11 = vpop.f32.mrf.mxu3 }
 0x3ce   : >> { %v1049_v58 = vmax.f32 %v1033_v27, 0.0 }
 0x3d1   : >> { %v998_v26 = vpop.f32.mrf.mxu2 }
 0x3d2   : >> { %v999_v47 = vadd.f32 %v998_v26, %v941_v22 }
 0x3d4   : >> { %v1034_v57 = vadd.f32 %v3417_v0, %v999_v47 }
 0x3d6   : >> { %v1050_v51 = vmax.f32 %v1034_v57, 0.0  ;;  %v961_v57 = vpop.f32.mrf.mxu3 }
 0x3d8   : >> { %v1085_v3 = vpack.c.bf16 %v1050_v51, %v1049_v58 }
 0x3d9   : >> { %v1001_v7 = vpop.f32.mrf.mxu2 }
 0x3da   : >> { %1189 = vmatmul.bf16.gmra.mxu3 %v1085_v3  ;;  %1238 = vmatmul.bf16.gmra.mxu0 %v1085_v3  ;;  %v1002_v4 = vadd.f32 %v1001_v7, %v944_v63 }
 0x3dc   : >> { %v1035_v14 = vadd.f32 %v3417_v0, %v1002_v4 }
 0x3de   : >> { %v1051_v21 = vmax.f32 %v1035_v14, 0.0 }
 0x3e1   : >> { %v1003_v13 = vpop.f32.mrf.mxu2 }
 0x3e2   : >> { %v1004_v15 = vadd.f32 %v1003_v13, %v946_v9  ;;  %v964_v9 = vpop.f32.mrf.mxu3 }
 0x3e4   : >> { %v1036_v16 = vadd.f32 %v3417_v0, %v1004_v15 }
 0x3e6   : >> { %v1052_v28 = vmax.f32 %v1036_v16, 0.0 }
 0x3e8   : >> { %v1086_v29 = vpack.c.bf16 %v1052_v28, %v1051_v21 }
 0x3e9   : >> { %v1006_v31 = vpop.f32.mrf.mxu2 }
 0x3ea   : >> { %1194 = vmatmul.bf16.gmra.mxu3 %v1086_v29  ;;  %1243 = vmatmul.bf16.gmra.mxu0 %v1086_v29  ;;  %v1007_v32 = vadd.f32 %v1006_v31, %v949_v8  ;;  %v966_v16 = vpop.f32.mrf.mxu3 }
 0x3ec   : >> { %v1037_v35 = vadd.f32 %v3417_v0, %v1007_v32 }
 0x3ee   : >> { %v1053_v46 = vmax.f32 %v1037_v35, 0.0 }
 0x3f1   : >> { %v1008_v34 = vpop.f32.mrf.mxu2 }
 0x3f2   : >> { %v1009_v36 = vadd.f32 %v1008_v34, %v951_v55 }
 0x3f4   : >> { %v1038_v44 = vadd.f32 %v3417_v0, %v1009_v36 }
 0x3f6   : >> { %v1054_v17 = vmax.f32 %v1038_v44, 0.0 }
 0x3f8   : >> { %v1087_v18 = vpack.c.bf16 %v1054_v17, %v1053_v46 }
 0x3f9   : >> { %v1011_v56 = vpop.f32.mrf.mxu2 }
 0x3fa   : >> { %1199 = vmatmul.bf16.gmra.mxu3 %v1087_v18  ;;  %1248 = vmatmul.bf16.gmra.mxu0 %v1087_v18  ;;  %v1012_v59 = vadd.f32 %v1011_v56, %v954_v33 }
 0x3fc   : >> { %v1039_v2 = vadd.f32 %v3417_v0, %v1012_v59 }
 0x3fe   : >> { %v1055_v25 = vmax.f32 %v1039_v2, 0.0 }
 0x401   : >> { %v1013_v61 = vpop.f32.mrf.mxu2 }
 0x402   : >> { %v1014_v5 = vadd.f32 %v1013_v61, %v956_v54 }
 0x404   : >> { %v1040_v22 = vadd.f32 %v3417_v0, %v1014_v5 }
 0x406   : >> { %v1056_v26 = vmax.f32 %v1040_v22, 0.0 }
 0x408   : >> { %v1088_v27 = vpack.c.bf16 %v1056_v26, %v1055_v25 }
 0x409   : >> { %v1016_v47 = vpop.f32.mrf.mxu2 }
 0x40a   : >> { %1204 = vmatmul.bf16.gmra.mxu3 %v1088_v27  ;;  %1253 = vmatmul.bf16.gmra.mxu0 %v1088_v27  ;;  %v1017_v58 = vadd.f32 %v1016_v47, %v959_v11 }
 0x40c   : >> { %v1041_v63 = vadd.f32 %v3417_v0, %v1017_v58 }
 0x40e   : >> { %v1057_v8 = vmax.f32 %v1041_v63, 0.0 }
 0x411   : >> { %v1018_v51 = vpop.f32.mrf.mxu2 }
 0x412   : >> { %v1019_v3 = vadd.f32 %v1018_v51, %v961_v57 }
 0x414   : >> { %v1042_v7 = vadd.f32 %v3417_v0, %v1019_v3 }
 0x416   : >> { %v1058_v4 = vmax.f32 %v1042_v7, 0.0 }
 0x418   : >> { %v1089_v13 = vpack.c.bf16 %v1058_v4, %v1057_v8  ;;  %v3444_v4 = vld [vmem:[%s3367_s17 + $0x1] ss:$0 sm:$0xff] }
 0x419   : >> { %v1021_v14 = vpop.f32.mrf.mxu2 }
 0x41a   : >> { %1209 = vmatmul.bf16.gmra.mxu3 %v1089_v13  ;;  %1258 = vmatmul.bf16.gmra.mxu0 %v1089_v13  ;;  %v1022_v15 = vadd.f32 %v1021_v14, %v964_v9 }
 0x41c   : >> { %v1043_v21 = vadd.f32 %v3417_v0, %v1022_v15 }
 0x41e   : >> { %v1059_v31 = vmax.f32 %v1043_v21, 0.0 }
 0x421   : >> { %v1023_v55 = vpop.f32.mrf.mxu2 }
 0x422   : >> { %v1024_v28 = vadd.f32 %v1023_v55, %v966_v16 }
 0x424   : >> { %v1044_v29 = vadd.f32 %v3417_v0, %v1024_v28 }
 0x426   : >> { %v1060_v32 = vmax.f32 %v1044_v29, 0.0 }
 0x428   : >> { %v1090_v33 = vpack.c.bf16 %v1060_v32, %v1059_v31 }
 0x42a   : >> { %1214 = vmatmul.bf16.gmra.mxu3 %v1090_v33  ;;  %1263 = vmatmul.bf16.gmra.mxu0 %v1090_v33 }
 0x437   : >> { %v1229_v3 = vpop.f32.mrf.mxu0 }
 0x43d   : >> { %v1180_v34 = vpop.f32.mrf.mxu3 }
 0x43f   : >> { %v1231_v7 = vpop.f32.mrf.mxu0 }
 0x445   : >> { %v1182_v35 = vpop.f32.mrf.mxu3 }
 0x446   : >> { %v1269_v36 = vpack.c.bf16 %v1182_v35, %v1180_v34 }
 0x447   : >> { %v1234_v8 = vpop.f32.mrf.mxu0 }
 0x44d   : >> { %v1185_v44 = vpop.f32.mrf.mxu3 }
 0x44f   : >> { %v1236_v9 = vpop.f32.mrf.mxu0 }
 0x455   : >> { %v1187_v46 = vpop.f32.mrf.mxu3 }
 0x456   : >> { %v1270_v17 = vpack.c.bf16 %v1187_v46, %v1185_v44 }
 0x457   : >> { %v1239_v31 = vpop.f32.mrf.mxu0 }
 0x45d   : >> { %v1190_v18 = vpop.f32.mrf.mxu3 }
 0x465   : >> { %v1192_v54 = vpop.f32.mrf.mxu3 }
 0x466   : >> { %v1271_v56 = vpack.c.bf16 %v1192_v54, %v1190_v18 }
 0x46d   : >> { %v1195_v59 = vpop.f32.mrf.mxu3 }
 0x475   : >> { %v1197_v61 = vpop.f32.mrf.mxu3 }
 0x476   : >> { %v1272_v2 = vpack.c.bf16 %v1197_v61, %v1195_v59 }
 0x47d   : >> { %v1200_v5 = vpop.f32.mrf.mxu3 }
 0x485   : >> { %v1202_v11 = vpop.f32.mrf.mxu3 }
 0x486   : >> { %v1273_v63 = vpack.c.bf16 %v1202_v11, %v1200_v5 }
 0x48d   : >> { %v1205_v0 = vpop.f32.mrf.mxu3 }
 0x495   : >> { %v1207_v22 = vpop.f32.mrf.mxu3 }
 0x496   : >> { %v1274_v51 = vpack.c.bf16 %v1207_v22, %v1205_v0 }
 0x49d   : >> { %v1210_v25 = vpop.f32.mrf.mxu3 }
 0x4a5   : >> { %v1212_v26 = vpop.f32.mrf.mxu3 }
 0x4a6   : >> { %v1275_v58 = vpack.c.bf16 %v1212_v26, %v1210_v25 }
 0x4ad   : >> { %v1215_v27 = vpop.f32.mrf.mxu3 }
 0x4b5   : >> { %v1217_v47 = vpop.f32.mrf.mxu3 }
 0x4b6   : >> { %v1276_v57 = vpack.c.bf16 %v1217_v47, %v1215_v27 }
 0x4b8   : >> { %1277 = vmatpush.bf16.msrb.mxu1 %v1276_v57 }
 0x4bc   : >> { %1278 = vmatpush.bf16.msrb.mxu1 %v1275_v58 }
 0x4c0   : >> { %1279 = vmatpush.bf16.msrb.mxu1 %v1274_v51 }
 0x4c4   : >> { %1280 = vmatpush.bf16.msrb.mxu1 %v1273_v63 }
 0x4c8   : >> { %1281 = vmatpush.bf16.msrb.mxu1 %v1272_v2 }
 0x4cc   : >> { %1282 = vmatpush.bf16.msrb.mxu1 %v1271_v56 }
 0x4d0   : >> { %1283 = vmatpush.bf16.msrb.mxu1 %v1270_v17  ;;  %v1241_v17 = vpop.f32.mrf.mxu0 }
 0x4d4   : >> { %1284 = vmatpush.bf16.msrb.mxu1 %v1269_v36 }
 0x4d7   : >> { %1285 = vmatmul.bf16.vlgmr.msrb.gmra.mxu1 %v3109_v38 }
 0x4d8   : >> { %v1244_v5 = vpop.f32.mrf.mxu0 }
 0x4e0   : >> { %v1246_v47 = vpop.f32.mrf.mxu0 }
 0x4e7   : >> { %1290 = vmatmul.bf16.gmra.mxu1 %v3113_v39 }
 0x4f7   : >> { %1295 = vmatmul.bf16.gmra.mxu1 %v3120_v41 }
 0x507   : >> { %1300 = vmatmul.bf16.gmra.mxu1 %v3127_v43 }
 0x517   : >> { %1305 = vmatmul.bf16.gmra.mxu1 %v3132_v45 }
 0x527   : >> { %1310 = vmatmul.bf16.gmra.mxu1 %v3135_v48 }
 0x537   : >> { %1315 = vmatmul.bf16.gmra.mxu1 %v3117_v40 }
 0x547   : >> { %1320 = vmatmul.bf16.gmra.mxu1 %v3124_v42 }
 0x554   : >> { %v1286_v13 = vpop.f32.mrf.mxu1 }
 0x555   : >> { %v1287_v14 = vadd.f32 %v1286_v13, %v1229_v3 }
 0x557   : >> { %v1329_v15 = vadd.f32 %v3444_v4, %v1287_v14 }
 0x559   : >> { %v1345_v16 = vmax.f32 %v1329_v15, 0.0 }
 0x55b   : >> { %v1361_v55 = vadd.f32 %v2922_v60, %v1345_v16 }
 0x55c   : >> { %v1288_v21 = vpop.f32.mrf.mxu1 }
 0x55d   : >> { %v3448_v60 = vmul.f32 0.5, %v1361_v55   ;;  %v1289_v29 = vadd.f32 %v1288_v21, %v1231_v7 }
 0x55f   : >> { %v3864_v28 = vmov %v3448_v60  ;;  %v1330_v32 = vadd.f32 %v3444_v4, %v1289_v29 }
 0x560   : > { %1393 = vst [vmem:[%s3177_s21] sm:$0xff] (%p3511_p0), %v3864_v28 }
 0x561   : >> { %v1346_v33 = vmax.f32 %v1330_v32, 0.0 }
 0x563   : >> { %v1362_v34 = vadd.f32 %v2918_v1, %v1346_v33 }
 0x564   : >> { %v1291_v35 = vpop.f32.mrf.mxu1 }
 0x565   : >> { %v3452_v1 = vmul.f32 0.5, %v1362_v34   ;;  %v1292_v44 = vadd.f32 %v1291_v35, %v1234_v8 }
 0x567   : >> { %v3865_v36 = vmov %v3452_v1  ;;  %v1331_v46 = vadd.f32 %v3444_v4, %v1292_v44 }
 0x568   : > { %1394 = vst [vmem:[%s3177_s21 + $0x8] sm:$0xff] (%p3511_p0), %v3865_v36 }
 0x569   : >> { %v1347_v18 = vmax.f32 %v1331_v46, 0.0 }
 0x56b   : >> { %v1363_v54 = vadd.f32 %v2914_v6, %v1347_v18 }
 0x56c   : >> { %v1293_v56 = vpop.f32.mrf.mxu1 }
 0x56d   : >> { %v3456_v6 = vmul.f32 0.5, %v1363_v54   ;;  %v1294_v60 = vadd.f32 %v1293_v56, %v1236_v9  ;;  %v1249_v9 = vpop.f32.mrf.mxu0 }
 0x56f   : >> { %v3866_v59 = vmov %v3456_v6  ;;  %v1332_v61 = vadd.f32 %v3444_v4, %v1294_v60 }
 0x570   : > { %1395 = vst [vmem:[%s3177_s21 + $0x10] sm:$0xff] (%p3511_p0), %v3866_v59 }
 0x571   : >> { %v1348_v2 = vmax.f32 %v1332_v61, 0.0 }
 0x573   : >> { %v1364_v11 = vadd.f32 %v2910_v12, %v1348_v2 }
 0x574   : >> { %v1296_v0 = vpop.f32.mrf.mxu1 }
 0x575   : >> { %v3460_v12 = vmul.f32 0.5, %v1364_v11   ;;  %v1297_v1 = vadd.f32 %v1296_v0, %v1239_v31  ;;  %v1251_v29 = vpop.f32.mrf.mxu0 }
 0x577   : >> { %v3867_v22 = vmov %v3460_v12  ;;  %v1333_v25 = vadd.f32 %v3444_v4, %v1297_v1 }
 0x578   : > { %1396 = vst [vmem:[%s3177_s21 + $0x18] sm:$0xff] (%p3511_p0), %v3867_v22 }
 0x579   : >> { %v1349_v26 = vmax.f32 %v1333_v25, 0.0 }
 0x57b   : >> { %v1365_v27 = vadd.f32 %v2906_v23, %v1349_v26 }
 0x57c   : >> { %v1298_v57 = vpop.f32.mrf.mxu1 }
 0x57d   : >> { %v3464_v23 = vmul.f32 0.5, %v1365_v27   ;;  %v1299_v6 = vadd.f32 %v1298_v57, %v1241_v17  ;;  %v1254_v46 = vpop.f32.mrf.mxu0 }
 0x57f   : >> { %v3868_v58 = vmov %v3464_v23  ;;  %v1334_v51 = vadd.f32 %v3444_v4, %v1299_v6 }
 0x580   : > { %1397 = vst [vmem:[%s3177_s21 + $0x20] sm:$0xff] (%p3511_p0), %v3868_v58 }
 0x581   : >> { %v1350_v63 = vmax.f32 %v1334_v51, 0.0 }
 0x583   : >> { %v1366_v3 = vadd.f32 %v2902_v30, %v1350_v63 }
 0x584   : >> { %v1301_v7 = vpop.f32.mrf.mxu1 }
 0x585   : >> { %v3468_v30 = vmul.f32 0.5, %v1366_v3   ;;  %v1302_v12 = vadd.f32 %v1301_v7, %v1244_v5  ;;  %v1256_v2 = vpop.f32.mrf.mxu0 }
 0x587   : >> { %v3869_v8 = vmov %v3468_v30  ;;  %v1335_v13 = vadd.f32 %v3444_v4, %v1302_v12 }
 0x588   : > { %1398 = vst [vmem:[%s3177_s21 + $0x28] sm:$0xff] (%p3511_p0), %v3869_v8 }
 0x589   : >> { %v1351_v14 = vmax.f32 %v1335_v13, 0.0 }
 0x58b   : >> { %v1367_v15 = vadd.f32 %v2898_v49, %v1351_v14 }
 0x58c   : >> { %v1303_v16 = vpop.f32.mrf.mxu1 }
 0x58d   : >> { %v3472_v49 = vmul.f32 0.5, %v1367_v15   ;;  %v1304_v23 = vadd.f32 %v1303_v16, %v1246_v47  ;;  %v1259_v47 = vpop.f32.mrf.mxu0 }
 0x58f   : >> { %v3870_v55 = vmov %v3472_v49  ;;  %v1336_v21 = vadd.f32 %v3444_v4, %v1304_v23 }
 0x590   : > { %1399 = vst [vmem:[%s3177_s21 + $0x30] sm:$0xff] (%p3511_p0), %v3870_v55 }
 0x591   : >> { %v1352_v31 = vmax.f32 %v1336_v21, 0.0 }
 0x593   : >> { %v1368_v32 = vadd.f32 %v2894_v62, %v1352_v31 }
 0x594   : >> { %v1306_v33 = vpop.f32.mrf.mxu1 }
 0x595   : >> { %v3476_v62 = vmul.f32 0.5, %v1368_v32   ;;  %v1307_v30 = vadd.f32 %v1306_v33, %v1249_v9  ;;  %v1261_v12 = vpop.f32.mrf.mxu0 }
 0x597   : >> { %v3871_v34 = vmov %v3476_v62  ;;  %v1337_v35 = vadd.f32 %v3444_v4, %v1307_v30 }
 0x598   : > { %1400 = vst [vmem:[%s3177_s21 + $0x38] sm:$0xff] (%p3511_p0), %v3871_v34 }
 0x599   : >> { %v1353_v44 = vmax.f32 %v1337_v35, 0.0 }
 0x59b   : >> { %v1369_v17 = vadd.f32 %v2890_v52, %v1353_v44 }
 0x59c   : >> { %v1308_v18 = vpop.f32.mrf.mxu1 }
 0x59d   : >> { %v3480_v52 = vmul.f32 0.5, %v1369_v17   ;;  %v1309_v49 = vadd.f32 %v1308_v18, %v1251_v29  ;;  %v1264_v21 = vpop.f32.mrf.mxu0 }
 0x59f   : >> { %v3872_v54 = vmov %v3480_v52  ;;  %v1338_v56 = vadd.f32 %v3444_v4, %v1309_v49 }
 0x5a0   : > { %1401 = vst [vmem:[%s3177_s21 + $0x40] sm:$0xff] (%p3511_p0), %v3872_v54 }
 0x5a1   : >> { %v1354_v60 = vmax.f32 %v1338_v56, 0.0 }
 0x5a3   : >> { %v1370_v61 = vadd.f32 %v2886_v10, %v1354_v60  ;;  %v3896_v60 = vmov %v3864_v28 }
 0x5a4   : >> { %v1311_v5 = vpop.f32.mrf.mxu1  ;;  %v2326_v60 = vld [vmem:[%s3849_s6 + $0x74] sm:$0xf0] (%p3511_p0) }
 0x5a5   : >> { %v3484_v10 = vmul.f32 0.5, %v1370_v61   ;;  %v1312_v62 = vadd.f32 %v1311_v5, %v1254_v46  ;;  %v1266_v44 = vpop.f32.mrf.mxu0 }
 0x5a7   : >> { %v3873_v11 = vmov %v3484_v10  ;;  %v1339_v0 = vadd.f32 %v3444_v4, %v1312_v62  ;;  %v3889_v62 = vmov %v3871_v34 }
 0x5a8   : > { %v2322_v62 = vld [vmem:[%s3849_s6 + $0x54] sm:$0xf0] (%p3511_p0)  ;;  %1402 = vst [vmem:[%s3177_s21 + $0x48] sm:$0xff] (%p3511_p0), %v3873_v11 }
 0x5a9   : >> { %v1355_v1 = vmax.f32 %v1339_v0, 0.0 }
 0x5ab   : >> { %v1371_v25 = vadd.f32 %v2882_v53, %v1355_v1  ;;  %v3895_v1 = vmov %v3865_v36 }
 0x5ac   : >> { %v1313_v26 = vpop.f32.mrf.mxu1  ;;  %v2219_v1 = vld [vmem:[%s3849_s6 + $0x40] sm:$0xf] (%p3511_p0) }
 0x5ad   : >> { %v3488_v53 = vmul.f32 0.5, %v1371_v25   ;;  %v1314_v52 = vadd.f32 %v1313_v26, %v1256_v2  ;;  %v2235_v2 = vld [vmem:[%s3849_s6 + $0x60] sm:$0xf] (%p3511_p0)  ;;  %v2320_v25 = vld [vmem:[%s3849_s6 + $0x44] sm:$0xf0] (%p3511_p0) }
 0x5ae   : > { %v2220_v26 = vor.u32 (%p3511_p0), %v2320_v25, %v2219_v1 }
 0x5af   : >> { %v3874_v27 = vmov %v3488_v53  ;;  %v1340_v57 = vadd.f32 %v3444_v4, %v1314_v52  ;;  %v3888_v52 = vmov %v3872_v54 }
 0x5b0   : > { %v2211_v52 = vld [vmem:[%s3849_s6 + $0x30] sm:$0xf] (%p3511_p0)  ;;  %1403 = vst [vmem:[%s3177_s21 + $0x50] sm:$0xff] (%p3511_p0), %v3874_v27 }
 0x5b1   : >> { %v1356_v6 = vmax.f32 %v1340_v57, 0.0 }
 0x5b3   : >> { %v1372_v51 = vadd.f32 %v2878_v20, %v1356_v6  ;;  %v3894_v6 = vmov %v3866_v59 }
 0x5b4   : >> { %v1316_v63 = vpop.f32.mrf.mxu1  ;;  %v2203_v6 = vld [vmem:[%s3849_s6 + $0x20] sm:$0xf] (%p3511_p0) }
 0x5b5   : >> { %v3492_v20 = vmul.f32 0.5, %v1372_v51   ;;  %v1317_v10 = vadd.f32 %v1316_v63, %v1259_v47  ;;  %v2318_v47 = vld [vmem:[%s3849_s6 + $0x34] sm:$0xf0] (%p3511_p0)  ;;  %v2316_v51 = vld [vmem:[%s3849_s6 + $0x24] sm:$0xf0] (%p3511_p0) }
 0x5b6   : > { %v2212_v57 = vor.u32 (%p3511_p0), %v2318_v47, %v2211_v52  ;;  %v2204_v63 = vor.u32 (%p3511_p0), %v2316_v51, %v2203_v6 }
 0x5b7   : >> { %v3875_v3 = vmov %v3492_v20  ;;  %v1341_v7 = vadd.f32 %v3444_v4, %v1317_v10  ;;  %v3887_v10 = vmov %v3873_v11 }
 0x5b8   : > { %1404 = vst [vmem:[%s3177_s21 + $0x58] sm:$0xff] (%p3511_p0), %v3875_v3  ;;  %v2195_v10 = vld [vmem:[%s3849_s6 + $0x10] sm:$0xf] (%p3511_p0) }
 0x5b9   : >> { %v1357_v9 = vmax.f32 %v1341_v7, 0.0  ;;  %v2314_v7 = vld [vmem:[%s3849_s6 + $0x14] sm:$0xf0] (%p3511_p0) }
 0x5bb   : >> { %v1373_v13 = vadd.f32 %v2874_v19, %v1357_v9  ;;  %v2187_v9 = vld [vmem:[%s3849_s6] sm:$0xf] (%p3511_p0) }
 0x5bc   : >> { %v1318_v14 = vpop.f32.mrf.mxu1 }
 0x5bd   : >> { %v3496_v19 = vmul.f32 0.5, %v1373_v13   ;;  %v1319_v53 = vadd.f32 %v1318_v14, %v1261_v12  ;;  %v3893_v12 = vmov %v3867_v22  ;;  %v2312_v13 = vld [vmem:[%s3849_s6 + $0x4] sm:$0xf0] (%p3511_p0) }
 0x5be   : > { %v2196_v12 = vor.u32 (%p3511_p0), %v2314_v7, %v2195_v10  ;;  %v2188_v14 = vor.u32 (%p3511_p0), %v2312_v13, %v2187_v9 }
 0x5bf   : >> { %v3876_v15 = vmov %v3496_v19  ;;  %v1342_v16 = vadd.f32 %v3444_v4, %v1319_v53  ;;  %v3886_v53 = vmov %v3874_v27 }
 0x5c0   : > { %1405 = vst [vmem:[%s3177_s21 + $0x60] sm:$0xff] (%p3511_p0), %v3876_v15  ;;  %v3649_v53 = vpack.c.bf16 (%p3511_p0), %v3865_v36, %v3864_v28  ;;  %v3669_v28 = vpack.c.bf16 (%p3511_p0), %v3869_v8, %v3868_v58  ;;  %v3674_v36 = vpack.c.bf16 (%p3511_p0), %v3871_v34, %v3870_v55  ;;  %v2323_v34 = vld [vmem:[%s3849_s6 + $0x64] sm:$0xf] (%p3511_p0) }
 0x5c1   : >> { %v1358_v23 = vmax.f32 %v1342_v16, 0.0 }
 0x5c3   : >> { %v1374_v29 = vadd.f32 %v2870_v24, %v1358_v23  ;;  %v3892_v23 = vmov %v3868_v58  ;;  %v2325_v58 = vld [vmem:[%s3849_s6 + $0x74] sm:$0xf] (%p3511_p0) }
 0x5c4   : >> { %v1321_v31 = vpop.f32.mrf.mxu1  ;;  %v3659_v23 = vpack.c.bf16 (%p3511_p0), %v3867_v22, %v3866_v59  ;;  %v3679_v59 = vpack.c.bf16 (%p3511_p0), %v3873_v11, %v3872_v54  ;;  %v3684_v22 = vpack.c.bf16 (%p3511_p0), %v3875_v3, %v3874_v27  ;;  %v2237_v54 = vld [vmem:[%s3849_s6 + $0x68] sm:$0xf0] (%p3511_p0)  ;;  %v2321_v27 = vld [vmem:[%s3849_s6 + $0x54] sm:$0xf] (%p3511_p0) }
 0x5c5   : >> { %v3500_v24 = vmul.f32 0.5, %v1374_v29   ;;  %v1322_v20 = vadd.f32 %v1321_v31, %v1264_v21  ;;  %v2240_v11 = vor.u32 (%p3511_p0), %v2323_v34, %v2237_v54  ;;  %v2319_v31 = vld [vmem:[%s3849_s6 + $0x44] sm:$0xf] (%p3511_p0) }
 0x5c7   : >> { %v3877_v32 = vmov %v3500_v24  ;;  %v1343_v33 = vadd.f32 %v3444_v4, %v1322_v20  ;;  %v3885_v20 = vmov %v3875_v3  ;;  %v2229_v3 = vld [vmem:[%s3849_s6 + $0x58] sm:$0xf0] (%p3511_p0) }
 0x5c8   : >> { %v3883_v24 = vmov %v3877_v32  ;;  %1406 = vst [vmem:[%s3177_s21 + $0x68] sm:$0xff] (%p3511_p0), %v3877_v32  ;;  %v3653_v16 = vpack.c.bf16 (%p3511_p0), %v3877_v32, %v3876_v15  ;;  %v2232_v29 = vor.u32 (%p3511_p0), %v2321_v27, %v2229_v3  ;;  %v2221_v32 = vld [vmem:[%s3849_s6 + $0x48] sm:$0xf0] (%p3511_p0) }
 0x5c9   : >> { %v1359_v30 = vmax.f32 %v1343_v33, 0.0  ;;  %v2324_v24 = vld [vmem:[%s3849_s6 + $0x64] sm:$0xf0] (%p3511_p0)  ;;  %v2224_v20 = vor.u32 (%p3511_p0), %v2319_v31, %v2221_v32 }
 0x5cb   : >> { %v1375_v35 = vadd.f32 %v2866_v37, %v1359_v30  ;;  %v3891_v30 = vmov %v3869_v8  ;;  %v2245_v8 = vld [vmem:[%s3849_s6 + $0x78] sm:$0xf0] (%p3511_p0) }
 0x5cc   : >> { %v1323_v46 = vpop.f32.mrf.mxu1  ;;  %v2317_v30 = vld [vmem:[%s3849_s6 + $0x34] sm:$0xf] (%p3511_p0) }
 0x5cd   : >> { %v3504_v37 = vmul.f32 0.5, %v1375_v35   ;;  %v1324_v19 = vadd.f32 %v1323_v46, %v1266_v44  ;;  %v2213_v35 = vld [vmem:[%s3849_s6 + $0x38] sm:$0xf0] (%p3511_p0) }
 0x5ce   : > { %v2216_v46 = vor.u32 (%p3511_p0), %v2317_v30, %v2213_v35 }
 0x5cf   : >> { %v3878_v17 = vmov %v3504_v37  ;;  %v1344_v18 = vadd.f32 %v3444_v4, %v1324_v19  ;;  %v3884_v19 = vmov %v3876_v15  ;;  %v2243_v4 = vld [vmem:[%s3849_s6 + $0x70] sm:$0xf] (%p3511_p0) }
 0x5d0   : >> { %v3882_v37 = vmov %v3878_v17  ;;  %v2244_v5 = vor.u32 (%p3511_p0), %v2326_v60, %v2243_v4  ;;  %1407 = vst [vmem:[%s3177_s21 + $0x70] sm:$0xff] (%p3511_p0), %v3878_v17  ;;  %v2315_v19 = vld [vmem:[%s3849_s6 + $0x24] sm:$0xf] (%p3511_p0)  ;;  %v2197_v4 = vld [vmem:[%s3849_s6 + $0x18] sm:$0xf0] (%p3511_p0) }
 0x5d1   : >> { %v1360_v49 = vmax.f32 %v1344_v18, 0.0  ;;  %v2236_v37 = vor.u32 (%p3511_p0), %v2324_v24, %v2235_v2  ;;  %v2205_v18 = vld [vmem:[%s3849_s6 + $0x28] sm:$0xf0] (%p3511_p0) }
 0x5d2   : > { %1514 = vmatpush.bf16.msra.mxu0 (%p3511_p0), %v2244_v5  ;;  %2353 = vmatpush.bf16.msra.mxu3 (%p3511_p0), %v2244_v5  ;;  %v2311_v5 = vld [vmem:[%s3849_s6 + $0x4] sm:$0xf] (%p3511_p0)  ;;  %v2189_v24 = vld [vmem:[%s3849_s6 + $0x8] sm:$0xf0] (%p3511_p0) }
 0x5d3   : >> { %v1376_v56 = vadd.f32 %v2862_v50, %v1360_v49  ;;  %v3890_v49 = vmov %v3870_v55  ;;  %v2248_v55 = vor.u32 (%p3511_p0), %v2325_v58, %v2245_v8 }
 0x5d4   : > { %743 = sbr.rel (!%p3511_p0) target bundleno = 549 (0x225), region = 128  ;;  %v2208_v49 = vor.u32 (%p3511_p0), %v2315_v19, %v2205_v18 }
 0x5d5   : >> { %v3508_v50 = vmul.f32 0.5, %v1376_v56   ;;  %1563 = vmatpush.bf16.msra.mxu1 (%p3511_p0), %v2248_v55 }
 0x5d6   : > { %1515 = vmatpush.bf16.msra.mxu0 (%p3511_p0), %v2236_v37  ;;  %2354 = vmatpush.bf16.msra.mxu3 (%p3511_p0), %v2236_v37  ;;  %v2192_v37 = vor.u32 (%p3511_p0), %v2311_v5, %v2189_v24 }
 0x5d7   : >> { %v3879_v61 = vmov %v3508_v50 }
 0x5d8   : >> { %v3881_v50 = vmov %v3879_v61  ;;  %1408 = vst [vmem:[%s3177_s21 + $0x78] sm:$0xff] (%p3511_p0), %v3879_v61  ;;  %v3663_v21 = vpack.c.bf16 (%p3511_p0), %v3879_v61, %v3878_v17  ;;  %v2313_v61 = vld [vmem:[%s3849_s6 + $0x14] sm:$0xf] (%p3511_p0) }
 0x5d9   : > { %v2227_v50 = vld [vmem:[%s3849_s6 + $0x50] sm:$0xf]  ;;  %1564 = vmatpush.bf16.msra.mxu1 %v2240_v11  ;;  %v2200_v2 = vor.u32 %v2313_v61, %v2197_v4 }
 0x5da   : > { %v2228_v0 = vor.u32 %v2322_v62, %v2227_v50 }
 0x5dc   : > { %1516 = vmatpush.bf16.msra.mxu0 %v2228_v0  ;;  %2355 = vmatpush.bf16.msra.mxu3 %v2228_v0 }
 0x5dd   : > { %1565 = vmatpush.bf16.msra.mxu1 %v2232_v29 }
 0x5e0   : > { %1517 = vmatpush.bf16.msra.mxu0 %v2220_v26  ;;  %2356 = vmatpush.bf16.msra.mxu3 %v2220_v26 }
 0x5e1   : > { %1566 = vmatpush.bf16.msra.mxu1 %v2224_v20 }
 0x5e4   : > { %1518 = vmatpush.bf16.msra.mxu0 %v2212_v57  ;;  %2357 = vmatpush.bf16.msra.mxu3 %v2212_v57 }
 0x5e5   : > { %1567 = vmatpush.bf16.msra.mxu1 %v2216_v46 }
 0x5e8   : > { %1519 = vmatpush.bf16.msra.mxu0 %v2204_v63  ;;  %2358 = vmatpush.bf16.msra.mxu3 %v2204_v63 }
 0x5e9   : > { %1568 = vmatpush.bf16.msra.mxu1 %v2208_v49 }
 0x5ec   : > { %1520 = vmatpush.bf16.msra.mxu0 %v2196_v12  ;;  %2359 = vmatpush.bf16.msra.mxu3 %v2196_v12 }
 0x5ed   : > { %1569 = vmatpush.bf16.msra.mxu1 %v2200_v2 }
 0x5f0   : > { %1521 = vmatpush.bf16.msra.mxu0 %v2188_v14  ;;  %2360 = vmatpush.bf16.msra.mxu3 %v2188_v14 }
 0x5f1   : > { %1570 = vmatpush.bf16.msra.mxu1 %v2192_v37 }
 0x5f3   : > { %1522 = vmatmul.bf16.vlgmr.msra.gmra.mxu0 %v3649_v53  ;;  %1552 = vmatmul.bf16.vlgmr.msra.gmra.mxu3 %v3653_v16 }
 0x5f4   : > { %2361 = vmatpush.bf16.msrb.mxu3 %v2248_v55  ;;  %1571 = vmatmul.bf16.vlgmr.msra.gmra.mxu1 %v3649_v53 }
 0x5f8   : > { %2362 = vmatpush.bf16.msrb.mxu3 %v2240_v11 }
 0x5fc   : > { %2363 = vmatpush.bf16.msrb.mxu3 %v2232_v29 }
 0x600   : > { %2364 = vmatpush.bf16.msrb.mxu3 %v2224_v20 }
 0x603   : > { %1527 = vmatmul.bf16.gmra.mxu0 %v3659_v23  ;;  %1557 = vmatmul.bf16.gmra.mxu3 %v3663_v21 }
 0x604   : > { %2365 = vmatpush.bf16.msrb.mxu3 %v2216_v46  ;;  %1576 = vmatmul.bf16.gmra.mxu1 %v3659_v23 }
 0x608   : > { %2366 = vmatpush.bf16.msrb.mxu3 %v2208_v49 }
 0x60c   : > { %2367 = vmatpush.bf16.msrb.mxu3 %v2200_v2 }
 0x610   : > { %2368 = vmatpush.bf16.msrb.mxu3 %v2192_v37 }
 0x613   : > { %1532 = vmatmul.bf16.gmra.mxu0 %v3669_v28  ;;  %1601 = vmatmul.bf16.vlgmr.msrb.gmra.mxu3 %v3653_v16 }
 0x614   : > { %1581 = vmatmul.bf16.gmra.mxu1 %v3669_v28 }
 0x623   : > { %1537 = vmatmul.bf16.gmra.mxu0 %v3674_v36  ;;  %1606 = vmatmul.bf16.gmra.mxu3 %v3663_v21 }
 0x624   : > { %1586 = vmatmul.bf16.gmra.mxu1 %v3674_v36 }
 0x633   : > { %1542 = vmatmul.bf16.gmra.mxu0 %v3679_v59 }
 0x634   : > { %1591 = vmatmul.bf16.gmra.mxu1 %v3679_v59 }
 0x643   : > { %1547 = vmatmul.bf16.gmra.mxu0 %v3684_v22 }
 0x644   : > { %1596 = vmatmul.bf16.gmra.mxu1 %v3684_v22 }
 0x670   : > { %v1523_v15 = vpop.f32.mrf.mxu0 }
 0x676   : > { %v1553_v33 = vpop.f32.mrf.mxu3 }
 0x678   : > { %v1525_v44 = vpop.f32.mrf.mxu0 }
 0x679   : > { %v1612_v17 = vpack.c.bf16 %v1525_v44, %v1523_v15 }
 0x67e   : > { %v1555_v56 = vpop.f32.mrf.mxu3 }
 0x67f   : > { %v1618_v52 = vpack.c.bf16 %v1555_v56, %v1553_v33 }
 0x680   : > { %v1528_v60 = vpop.f32.mrf.mxu0 }
 0x686   : > { %v1558_v50 = vpop.f32.mrf.mxu3 }
 0x688   : > { %v1530_v62 = vpop.f32.mrf.mxu0 }
 0x689   : > { %v1613_v0 = vpack.c.bf16 %v1530_v62, %v1528_v60 }
 0x68e   : > { %v1560_v1 = vpop.f32.mrf.mxu3 }
 0x68f   : > { %v1619_v25 = vpack.c.bf16 %v1560_v1, %v1558_v50 }
 0x690   : > { %v1533_v26 = vpop.f32.mrf.mxu0 }
 0x691   : > { %1620 = vmatpush.bf16.msra.mxu2 %v1619_v25  ;;  %2369 = vmatpush.bf16.msra.mxu3 %v1619_v25 }
 0x695   : > { %1621 = vmatpush.bf16.msra.mxu2 %v1618_v52  ;;  %2370 = vmatpush.bf16.msra.mxu3 %v1618_v52 }
 0x696   : > { %v1602_v53 = vpop.f32.mrf.mxu3 }
 0x698   : > { %v1535_v47 = vpop.f32.mrf.mxu0 }
 0x699   : > { %v1614_v14 = vpack.c.bf16 %v1535_v47, %v1533_v26 }
 0x6a0   : > { %v1538_v57 = vpop.f32.mrf.mxu0 }
 0x6a8   : > { %v1540_v6 = vpop.f32.mrf.mxu0 }
 0x6a9   : > { %v1615_v13 = vpack.c.bf16 %v1540_v6, %v1538_v57 }
 0x6b0   : > { %v1543_v51 = vpop.f32.mrf.mxu0 }
 0x6b8   : > { %v1545_v63 = vpop.f32.mrf.mxu0 }
 0x6b9   : > { %v1616_v9 = vpack.c.bf16 %v1545_v63, %v1543_v51 }
 0x6c0   : > { %v1548_v10 = vpop.f32.mrf.mxu0 }
 0x6c8   : > { %v1550_v7 = vpop.f32.mrf.mxu0 }
 0x6c9   : > { %v1617_v12 = vpack.c.bf16 %v1550_v7, %v1548_v10 }
 0x6cb   : > { %1622 = vmatpush.bf16.msra.mxu2 %v1617_v12  ;;  %2371 = vmatpush.bf16.msra.mxu3 %v1617_v12 }
 0x6cf   : > { %1623 = vmatpush.bf16.msra.mxu2 %v1616_v9  ;;  %2372 = vmatpush.bf16.msra.mxu3 %v1616_v9 }
 0x6d3   : > { %1624 = vmatpush.bf16.msra.mxu2 %v1615_v13  ;;  %2373 = vmatpush.bf16.msra.mxu3 %v1615_v13 }
 0x6d7   : > { %1625 = vmatpush.bf16.msra.mxu2 %v1614_v14  ;;  %2374 = vmatpush.bf16.msra.mxu3 %v1614_v14 }
 0x6db   : > { %1626 = vmatpush.bf16.msra.mxu2 %v1613_v0  ;;  %2375 = vmatpush.bf16.msra.mxu3 %v1613_v0 }
 0x6df   : > { %1627 = vmatpush.bf16.msra.mxu2 %v1612_v17  ;;  %2376 = vmatpush.bf16.msra.mxu3 %v1612_v17 }
 0x6e2   : > { %1628 = vmatmul.bf16.vlgmr.msra.gmra.mxu2 %v3109_v38  ;;  %1658 = vmatmul.bf16.vlgmr.msra.gmra.mxu3 %v3117_v40  ;;  %v1604_v38 = vpop.f32.mrf.mxu3 }
 0x6f2   : > { %1633 = vmatmul.bf16.gmra.mxu2 %v3113_v39  ;;  %1663 = vmatmul.bf16.gmra.mxu3 %v3124_v42 }
 0x702   : > { %1638 = vmatmul.bf16.gmra.mxu2 %v3120_v41 }
 0x712   : > { %1643 = vmatmul.bf16.gmra.mxu2 %v3127_v43 }
 0x722   : > { %1648 = vmatmul.bf16.gmra.mxu2 %v3132_v45 }
 0x732   : > { %1653 = vmatmul.bf16.gmra.mxu2 %v3135_v48 }
 0x733   : > { %2715 = shalt.err (!%p2712_p9)
}
 0x734   : > { %s2935_s21 = smov 128   ;;  %s2936_s25 = smov 8   ;;  %v1572_v39 = vpop.f32.mrf.mxu1  ;;  %v1607_v40 = vpop.f32.mrf.mxu3  ;;  %v3772_v45 = vld [vmem:[#allocation7] ss:$0 sm:$0xff] }
 0x735   : > { %2390 = dma.vmem_to_hbm [thread:$0]  (%p3025_p5), %s1740_s29, 2048, %s1742_s11, %s1710_s24, %s2935_s21, %s2935_s21, %s2936_s25  }
 0x736   : > { %s1721_s11 = scalar_lea.hbm %s3851_s8, %s2327_s22  ;;  %s1722_s24 = sshll.u32 %s3173_s18, 4  ;;  %s1723_s24 = int_to_ptr.vmem [resolvable:$true] %s1722_s24 }
 0x737   : > { %s1724_s1 = sshll.u32 %s1721_s11, 4  ;;  %s1705_s26 = scalar_lea.sflag [#allocation4], %s3074_s4  ;;  %s1725_s1 = int_to_ptr.hbm [resolvable:$true] %s1724_s1 }
 0x738   : > { %s2730_s27 = sshra.s32 %s1725_s1, 4  ;;  %s2736_s16 = scalar_lea.hbm %s3851_s8, 256  ;;  %s2731_s27 = int_to_ptr.hbm [resolvable:$true] %s2730_s27 }
 0x739   : > { %s2732_s14 = scalar_lea.hbm %s2731_s27, 128  ;;  %p2737_p13 = scmp.lt.s32.totalorder %s2731_s27, %s3851_s8 }
 0x73a   : > { %p2733_p10 = scmp.ne.s32.totalorder %s2731_s27, %s2732_s14  ;;  %p2738_p0 = scmp.lt.s32.totalorder %s2736_s16, %s2732_s14 }
 0x73c   : > { %v1574_v41 = vpop.f32.mrf.mxu1  ;;  %v1609_v42 = vpop.f32.mrf.mxu3  ;;  %p2734_p11 = pnand %p2733_p10, %p3025_p5  ;;  %p2739_p1 = por %p2738_p0, %p2737_p13 }
 0x73e   : > { %p2735_p12 = pneg %p2734_p11 }
 0x740   : > { %p2740_p2 = pnand %p2739_p1, %p2735_p12 }
 0x744   : > { %v1577_v43 = vpop.f32.mrf.mxu1 }
 0x74c   : > { %v1579_v59 = vpop.f32.mrf.mxu1 }
 0x754   : > { %v1582_v29 = vpop.f32.mrf.mxu1 }
 0x75c   : > { %v1584_v17 = vpop.f32.mrf.mxu1 }
 0x764   : > { %v1587_v56 = vpop.f32.mrf.mxu1 }
 0x765   : > { %v1629_v48 = vpop.f32.mrf.mxu2  ;;  %v1659_v16 = vpop.f32.mrf.mxu3 }
 0x766   : > { %v1630_v23 = vadd.f32 %v1629_v48, %v1572_v39  ;;  %v1660_v21 = vadd.f32 %v1659_v16, %v1602_v53 }
 0x768   : > { %v1672_v28 = vadd.f32 %v3772_v45, %v1630_v23  ;;  %v1684_v36 = vadd.f32 %v3772_v45, %v1660_v21 }
 0x76a   : > { %1688 = vst [vmem:[%s3173_s18] sm:$0xff] %v1672_v28 }
 0x76b   : > { %1700 = vst [vmem:[%s3173_s18 + $0x60] sm:$0xff] %v1684_v36 }
 0x76c   : > { %v1589_v2 = vpop.f32.mrf.mxu1 }
 0x76d   : > { %v1631_v22 = vpop.f32.mrf.mxu2  ;;  %v1661_v58 = vpop.f32.mrf.mxu3 }
 0x76e   : > { %v1632_v8 = vadd.f32 %v1631_v22, %v1574_v41  ;;  %v1662_v55 = vadd.f32 %v1661_v58, %v1604_v38 }
 0x770   : > { %v1673_v34 = vadd.f32 %v3772_v45, %v1632_v8  ;;  %v1685_v54 = vadd.f32 %v3772_v45, %v1662_v55 }
 0x772   : > { %1689 = vst [vmem:[%s3173_s18 + $0x8] sm:$0xff] %v1673_v34 }
 0x773   : > { %1701 = vst [vmem:[%s3173_s18 + $0x68] sm:$0xff] %v1685_v54 }
 0x774   : > { %v1592_v0 = vpop.f32.mrf.mxu1 }
 0x775   : > { %v1634_v11 = vpop.f32.mrf.mxu2  ;;  %v1664_v27 = vpop.f32.mrf.mxu3 }
 0x776   : > { %v1635_v3 = vadd.f32 %v1634_v11, %v1577_v43  ;;  %v1665_v15 = vadd.f32 %v1664_v27, %v1607_v40 }
 0x778   : > { %v1674_v31 = vadd.f32 %v3772_v45, %v1635_v3  ;;  %v1686_v32 = vadd.f32 %v3772_v45, %v1665_v15 }
 0x77a   : > { %1690 = vst [vmem:[%s3173_s18 + $0x10] sm:$0xff] %v1674_v31 }
 0x77b   : > { %1702 = vst [vmem:[%s3173_s18 + $0x70] sm:$0xff] %v1686_v32 }
 0x77c   : > { %v1594_v47 = vpop.f32.mrf.mxu1 }
 0x77d   : > { %v1636_v20 = vpop.f32.mrf.mxu2  ;;  %v1666_v33 = vpop.f32.mrf.mxu3 }
 0x77e   : > { %v1637_v30 = vadd.f32 %v1636_v20, %v1579_v59  ;;  %v1667_v35 = vadd.f32 %v1666_v33, %v1609_v42 }
 0x780   : > { %v1675_v44 = vadd.f32 %v3772_v45, %v1637_v30  ;;  %v1687_v46 = vadd.f32 %v3772_v45, %v1667_v35 }
 0x782   : > { %1691 = vst [vmem:[%s3173_s18 + $0x18] sm:$0xff] %v1675_v44 }
 0x783   : > { %1703 = vst [vmem:[%s3173_s18 + $0x78] sm:$0xff] %v1687_v46 }
 0x784   : > { %v1597_v63 = vpop.f32.mrf.mxu1 }
 0x785   : > { %v1639_v19 = vpop.f32.mrf.mxu2 }
 0x786   : > { %v1640_v18 = vadd.f32 %v1639_v19, %v1582_v29 }
 0x788   : > { %v1676_v49 = vadd.f32 %v3772_v45, %v1640_v18 }
 0x78a   : > { %1692 = vst [vmem:[%s3173_s18 + $0x20] sm:$0xff] %v1676_v49 }
 0x78c   : > { %v1599_v9 = vpop.f32.mrf.mxu1 }
 0x78d   : > { %v1641_v61 = vpop.f32.mrf.mxu2 }
 0x78e   : > { %v1642_v4 = vadd.f32 %v1641_v61, %v1584_v17 }
 0x790   : > { %v1677_v60 = vadd.f32 %v3772_v45, %v1642_v4 }
 0x792   : > { %1693 = vst [vmem:[%s3173_s18 + $0x28] sm:$0xff] %v1677_v60 }
 0x795   : > { %v1644_v5 = vpop.f32.mrf.mxu2 }
 0x796   : > { %v1645_v24 = vadd.f32 %v1644_v5, %v1587_v56 }
 0x798   : > { %v1678_v37 = vadd.f32 %v3772_v45, %v1645_v24 }
 0x79a   : > { %1694 = vst [vmem:[%s3173_s18 + $0x30] sm:$0xff] %v1678_v37 }
 0x79d   : > { %v1646_v50 = vpop.f32.mrf.mxu2 }
 0x79e   : > { %v1647_v62 = vadd.f32 %v1646_v50, %v1589_v2 }
 0x7a0   : > { %v1679_v1 = vadd.f32 %v3772_v45, %v1647_v62 }
 0x7a2   : > { %1695 = vst [vmem:[%s3173_s18 + $0x38] sm:$0xff] %v1679_v1 }
 0x7a5   : > { %v1649_v25 = vpop.f32.mrf.mxu2 }
 0x7a6   : > { %v1650_v26 = vadd.f32 %v1649_v25, %v1592_v0 }
 0x7a8   : > { %v1680_v52 = vadd.f32 %v3772_v45, %v1650_v26 }
 0x7aa   : > { %1696 = vst [vmem:[%s3173_s18 + $0x40] sm:$0xff] %v1680_v52 }
 0x7ad   : > { %v1651_v57 = vpop.f32.mrf.mxu2 }
 0x7ae   : > { %v1652_v6 = vadd.f32 %v1651_v57, %v1594_v47 }
 0x7b0   : > { %v1681_v51 = vadd.f32 %v3772_v45, %v1652_v6 }
 0x7b2   : > { %1697 = vst [vmem:[%s3173_s18 + $0x48] sm:$0xff] %v1681_v51 }
 0x7b5   : > { %v1654_v10 = vpop.f32.mrf.mxu2 }
 0x7b6   : > { %v1655_v7 = vadd.f32 %v1654_v10, %v1597_v63 }
 0x7b8   : > { %v1682_v12 = vadd.f32 %v3772_v45, %v1655_v7 }
 0x7ba   : > { %1698 = vst [vmem:[%s3173_s18 + $0x50] sm:$0xff] %v1682_v12 }
 0x7bd   : > { %v1656_v13 = vpop.f32.mrf.mxu2 }
 0x7be   : > { %v1657_v14 = vadd.f32 %v1656_v13, %v1599_v9 }
 0x7c0   : > { %v1683_v53 = vadd.f32 %v3772_v45, %v1657_v14 }
 0x7c2   : > { %1699 = vst [vmem:[%s3173_s18 + $0x58] sm:$0xff] %v1683_v53 }
 0x7c3   : > { %2743 = shalt.err (!%p2740_p2)
}
 0x7c4   : > { %2389 = dma.vmem_to_hbm [thread:$0]  (%p3025_p5), %s1723_s24, 2048, %s1725_s1, %s1705_s26, %s2935_s21, %s2935_s21, %s2936_s25  }
 0x7c5 PF: > { %p2416_p3 = scmp.ge.s32.totalorder %s2858_s12, 2  ;;  %s1756_s4 = sand.u32 1, %s2846_s30  }
 0x7c6   : > { %s1757_s18 = scalar_lea.sflag [#allocation4], %s1756_s4 }
 0x7c7   : > { %p2404_p4 = pnand %p2416_p3, %p3029_p6 }
 0x7c9   : > { %p2405_p7 = pneg %p2404_p4 }
 0x7cb   : > { %2837 = dma.done.wait (%p2405_p7), %s1757_s18, 2048  }
 0x7cc   : > { %2839 = vsyncadd (%p2405_p7), %s1757_s18, 4294965248  ;;  %s1767_s28 = scalar_lea.sflag [#allocation10], %s1756_s4 }
 0x7cd   : > { %2841 = dma.done.wait (%p2405_p7), %s1767_s28, 2048  }
 0x7ce   : > { %2843 = vsyncadd (%p2405_p7), %s1767_s28, 4294965248  ;;  %s3897_s19 = sld [smem:[#allocation15_spill]]  ;;  %p25_p5 = scmp.ge.s32.totalorder %s3012_s15, 4  }
 0x7cf   : > { %s3898_s11 = sld [smem:[#allocation16_spill]]  ;;  %s3899_s30 = smov %s2850_s10 }
 0x7d0   : > { %s3901_s12 = smov %s3012_s15  ;;  %27 = sbr.rel (!%p25_p5) target bundleno = 10 (0xa), region = 139 }
 0x7d4   : > { %s3900_s10 = smov %s3897_s19 }
 0x7d5   :  { %1773 = vsyncpa [#allocation3], 1 }
 0x7d6   :  { %1775 = vsyncpa [#allocation3 + $0x1], 1 }
 0x7d7   :  { %1776 = vsyncpa [#allocation6], 1 }
 0x7d8   :  { %1777 = vsyncpa [#allocation4], 1 }
 0x7d9   :  { %1779 = vsyncpa [#allocation4 + $0x1], 1 }
 0x7da   :  { %1780 = vsyncpa [#allocation10], 1 }
 0x7db   :  { %1782 = vsyncpa [#allocation10 + $0x1], 1 }

</bundles_post_ra>
